<compile_context>
chip_gen: v7x
topology: tpu7x:2x2x1
jax: 0.10.0
libtpu: 0.0.40
codegen_flags: <defaults>
</compile_context>

<pallas_src>
import functools
import math

import jax
import jax.numpy as jnp
from jax.experimental import pallas as pl
from jax.experimental.pallas import tpu as pltpu


def _round_up(x, m):
    return ((x + m - 1) // m) * m


# ---------------------------------------------------------------------------
# In-kernel helpers (f32 VPU math; MXU operands are cast to bf16 at use sites)
# ---------------------------------------------------------------------------

def _layer_norm(x, gb, eps):
    """x: (M, D) f32; gb: (2, D) f32 with row 0 = gamma, row 1 = beta."""
    mu = jnp.mean(x, axis=-1, keepdims=True)
    xc = x - mu
    var = jnp.mean(xc * xc, axis=-1, keepdims=True)
    return xc * jax.lax.rsqrt(var + eps) * gb[0:1, :] + gb[1:2, :]


_ERF_P = 0.3275911
_ERF_A = (0.254829592, -0.284496736, 1.421413741, -1.453152027, 1.061405429)


def _erf(x):
    # Abramowitz & Stegun 7.1.26.  Built only from exp / mul / add / where so it
    # lowers cleanly in Mosaic.  The 1/(1+p|x|) divide goes to the EUP slot via
    # pl.reciprocal(approx=True) (review item); ~1e-3 rel. error vs exact divide.
    ax = jnp.abs(x)
    t = pl.reciprocal(1.0 + _ERF_P * ax, approx=True)
    a1, a2, a3, a4, a5 = _ERF_A
    poly = ((((a5 * t + a4) * t + a3) * t + a2) * t + a1) * t
    e = 1.0 - poly * jnp.exp(-ax * ax)
    return jnp.where(x < 0.0, -e, e)


def _gelu_exact(x):
    # Matches torch.nn.GELU() (erf formulation) up to the approximations above.
    return 0.5 * x * (1.0 + _erf(x * 0.7071067811865476))


# ---------------------------------------------------------------------------
# Kernel 1: patch embedding (ImageNet normalize pre-folded into bf16 weights)
# ---------------------------------------------------------------------------

def _patch_embed_kernel(x_ref, w_ref, b_ref, o_ref):
    y = jnp.dot(x_ref[...].astype(jnp.bfloat16), w_ref[...],
                preferred_element_type=jnp.float32)
    o_ref[...] = (y + b_ref[...]).astype(o_ref.dtype)


def patch_embed(patches, w_folded, b_folded, *, tm):
    M, K = patches.shape          # K is already 128-lane padded
    D = w_folded.shape[1]
    flops = 2 * M * K * D
    bytes_accessed = (int(patches.size) * 4 + int(w_folded.size) * 2
                      + int(b_folded.size) * 4 + M * D * 4)
    return pl.pallas_call(
        _patch_embed_kernel,
        out_shape=jax.ShapeDtypeStruct((M, D), jnp.float32),
        grid=(M // tm,),
        in_specs=[pl.BlockSpec((tm, K), lambda i: (i, 0)),
                  pl.BlockSpec((K, D), lambda i: (0, 0)),
                  pl.BlockSpec((1, D), lambda i: (0, 0))],
        out_specs=pl.BlockSpec((tm, D), lambda i: (i, 0)),
        compiler_params=pltpu.CompilerParams(dimension_semantics=("parallel",)),
        cost_estimate=pl.CostEstimate(flops=int(flops), transcendentals=0,
                                      bytes_accessed=int(bytes_accessed)),
    )(patches, w_folded, b_folded)


# ---------------------------------------------------------------------------
# Kernel 2: fused pre-norm transformer block (MHSA + MLP), one call per block
# ---------------------------------------------------------------------------

def _block_kernel(x_ref, ln1_ref, qkvw_ref, qkvb_ref, projw_ref, projb_ref,
                  ln2_ref, fc1w_ref, fc1b_ref, fc2w_ref, fc2b_ref, o_ref,
                  *, nh, dh, n_valid, eps):
    f32, bf16 = jnp.float32, jnp.bfloat16
    x = x_ref[0]                                               # (Npad, D) f32 residual
    n_pad, d = x.shape

    # Additive key-padding bias: 0 for valid keys, -1e30 for padded keys.
    # Row vector only (no N^2 mask live across the head loop), finite -> no NaN.
    key_bias = jnp.where(
        jax.lax.broadcasted_iota(jnp.int32, (1, n_pad), 1) < n_valid,
        0.0, -1e30).astype(f32)

    # ---------------- multi-head self-attention ----------------
    h = _layer_norm(x, ln1_ref[...], eps)
    # 1/sqrt(dh) is folded into the Q columns of qkv_w / qkv_b at init.
    qkv = (jnp.dot(h.astype(bf16), qkvw_ref[...], preferred_element_type=f32)
           + qkvb_ref[...]).astype(bf16)                       # (Npad, 3D) bf16, cast once
    # TODO(synk): at real DINOv2-L sizes (N~1370, nh=16, D=1024, hidden=4096)
    # replace this whole-sequence attention with flash-style q/kv tiling +
    # online-softmax scratch, k-tile fc1/fc2, switch the head loop to
    # lax.fori_loop (bound live ranges), add a q-tile "parallel" grid axis,
    # mark the grid-invariant weight specs pl.Buffered(1), raise
    # vmem_limit_bytes, and prefetch block l+1 weights cross-call.
    heads = []
    for hi in range(nh):
        q = qkv[:, hi * dh:(hi + 1) * dh]
        k = qkv[:, d + hi * dh:d + (hi + 1) * dh]
        v = qkv[:, 2 * d + hi * dh:2 * d + (hi + 1) * dh]
        s = jax.lax.dot_general(q, k, (((1,), (1,)), ((), ())),
                                preferred_element_type=f32)    # (Npad, Npad)
        s = s + key_bias
        m = jnp.max(s, axis=-1, keepdims=True)
        p = jnp.exp(s - m)
        l = jnp.sum(p, axis=-1, keepdims=True)
        oh = jnp.dot(p.astype(bf16), v, preferred_element_type=f32)   # (Npad, dh)
        # normalization deferred past P@V: O(N*dh) instead of O(N^2) VALU work
        heads.append(oh * pl.reciprocal(l, approx=True))
    # One lane-dense (Npad, D) operand -> a SINGLE full-K output projection.
    attn = jnp.concatenate(heads, axis=-1).astype(bf16)        # (Npad, D) bf16
    x = x + (jnp.dot(attn, projw_ref[...], preferred_element_type=f32)
             + projb_ref[...])

    # ---------------- MLP ----------------
    h = _layer_norm(x, ln2_ref[...], eps)
    h = jnp.dot(h.astype(bf16), fc1w_ref[...],
                preferred_element_type=f32) + fc1b_ref[...]
    h = _gelu_exact(h)                                         # exact erf GELU
    h = jnp.dot(h.astype(bf16), fc2w_ref[...],
                preferred_element_type=f32) + fc2b_ref[...]
    x = x + h

    o_ref[0] = x.astype(o_ref.dtype)


def transformer_block(x_tok, blk, *, nh, n_valid, eps=1e-6):
    B, Npad, D = x_tok.shape
    dh = D // nh
    hidden = blk["fc1_w"].shape[1]

    flops = B * (2 * Npad * D * 3 * D          # qkv
                 + nh * 4 * Npad * Npad * dh   # q@k^T and p@v
                 + 2 * Npad * D * D            # output projection
                 + 4 * Npad * D * hidden)      # fc1 + fc2
    transcendentals = B * (nh * Npad * Npad + 2 * Npad * hidden + nh * Npad)
    param_bytes = sum(int(v.size) * v.dtype.itemsize for v in blk.values())
    bytes_accessed = 2 * int(x_tok.size) * x_tok.dtype.itemsize + param_bytes

    full = lambda a: pl.BlockSpec(a.shape, lambda b: (0, 0))
    tok_spec = pl.BlockSpec((1, Npad, D), lambda b: (b, 0, 0))

    return pl.pallas_call(
        functools.partial(_block_kernel, nh=nh, dh=dh, n_valid=n_valid, eps=eps),
        out_shape=jax.ShapeDtypeStruct((B, Npad, D), x_tok.dtype),
        grid=(B,),
        in_specs=[tok_spec,
                  full(blk["ln1"]), full(blk["qkv_w"]), full(blk["qkv_b"]),
                  full(blk["proj_w"]), full(blk["proj_b"]),
                  full(blk["ln2"]), full(blk["fc1_w"]), full(blk["fc1_b"]),
                  full(blk["fc2_w"]), full(blk["fc2_b"])],
        out_specs=tok_spec,
        compiler_params=pltpu.CompilerParams(
            dimension_semantics=("parallel",),   # megacore gets one batch each
            vmem_limit_bytes=32 * 1024 * 1024),
        cost_estimate=pl.CostEstimate(flops=int(flops),
                                      transcendentals=int(transcendentals),
                                      bytes_accessed=int(bytes_accessed)),
    )(x_tok, blk["ln1"], blk["qkv_w"], blk["qkv_b"], blk["proj_w"],
      blk["proj_b"], blk["ln2"], blk["fc1_w"], blk["fc1_b"],
      blk["fc2_w"], blk["fc2_b"])


# ---------------------------------------------------------------------------
# Kernel 3: final LayerNorm, fused with CLS-drop and transpose(1, 2)
#           (writes 'x_norm_patchtokens' already laid out as (B, D, Np))
# ---------------------------------------------------------------------------

def _final_norm_kernel(x_ref, gb_ref, o_ref, *, eps, n_valid):
    y = _layer_norm(x_ref[0], gb_ref[...], eps)          # (Npad, D) f32
    yt = jnp.transpose(y)                                # (D, Npad) via XLU
    o_ref[0] = yt[:, 1:n_valid]                          # drop CLS + padding


def final_norm_transpose(x_tok, gb, *, n_valid, eps=1e-6):
    B, Npad, D = x_tok.shape
    Np = n_valid - 1
    return pl.pallas_call(
        functools.partial(_final_norm_kernel, eps=eps, n_valid=n_valid),
        out_shape=jax.ShapeDtypeStruct((B, D, Np), jnp.float32),
        grid=(B,),
        in_specs=[pl.BlockSpec((1, Npad, D), lambda b: (b, 0, 0)),
                  pl.BlockSpec(gb.shape, lambda b: (0, 0))],
        out_specs=pl.BlockSpec((1, D, Np), lambda b: (b, 0, 0)),
        compiler_params=pltpu.CompilerParams(dimension_semantics=("parallel",)),
        cost_estimate=pl.CostEstimate(
            flops=int(10 * B * Npad * D), transcendentals=int(B * Npad),
            bytes_accessed=int(x_tok.size) * 4 + int(B * D * Np) * 4),
    )(x_tok, gb)


# ---------------------------------------------------------------------------
# Synthetic ViT parameters (deterministic; normalize + attn scale pre-folded)
# ---------------------------------------------------------------------------

def init_vit_params(key, *, embed_dim, depth, num_heads, mlp_ratio, patch_size,
                    in_chans, num_patches, mean, std):
    D = embed_dim
    K = in_chans * patch_size * patch_size
    Kpad = _round_up(K, 128)                  # 128-lane aligned contraction dim
    hidden = int(embed_dim * mlp_ratio)
    dh = D // num_heads
    attn_scale = 1.0 / math.sqrt(dh)
    s = 0.02
    keys = iter(jax.random.split(key, 3 + 4 * depth))

    # patch-embed conv (kernel = stride = patch) expressed as a (K, D) GEMM with
    # the ImageNet normalize (x - mean) / std folded into the weights/bias.
    patch_w = s * jax.random.normal(next(keys), (K, D), jnp.float32)
    patch_b = jnp.zeros((D,), jnp.float32)
    inv_std_k = jnp.repeat(1.0 / std, patch_size * patch_size)    # (K,), C-major
    shift_k = jnp.repeat(mean / std, patch_size * patch_size)     # (K,)
    w_folded = jnp.pad(patch_w * inv_std_k[:, None],
                       ((0, Kpad - K), (0, 0))).astype(jnp.bfloat16)
    b_folded = (patch_b - shift_k @ patch_w).reshape(1, D)

    def ln_params():   # row 0 = gamma, row 1 = beta
        return jnp.concatenate([jnp.ones((1, D), jnp.float32),
                                jnp.zeros((1, D), jnp.float32)], axis=0)

    # 1/sqrt(dh) folded into the Q third of the QKV projection (weights + bias).
    q_scale = jnp.concatenate([jnp.full((1, D), attn_scale, jnp.float32),
                               jnp.ones((1, 2 * D), jnp.float32)], axis=1)

    params = {
        "patch_w": w_folded,                                     # (Kpad, D) bf16
        "patch_b": b_folded,                                     # (1, D)    f32
        "cls_token": s * jax.random.normal(next(keys), (1, 1, D), jnp.float32),
        "pos_embed": s * jax.random.normal(next(keys), (1, num_patches + 1, D),
                                           jnp.float32),
        "norm": ln_params(),                                     # (2, D) f32
        "blocks": [],
    }
    for _ in range(depth):
        qkv_w = s * jax.random.normal(next(keys), (D, 3 * D), jnp.float32)
        qkv_b = jnp.zeros((1, 3 * D), jnp.float32)
        params["blocks"].append({
            "ln1": ln_params(),
            "qkv_w": (qkv_w * q_scale).astype(jnp.bfloat16),
            "qkv_b": qkv_b * q_scale,
            "proj_w": (s * jax.random.normal(next(keys), (D, D),
                                             jnp.float32)).astype(jnp.bfloat16),
            "proj_b": jnp.zeros((1, D), jnp.float32),
            "ln2": ln_params(),
            "fc1_w": (s * jax.random.normal(next(keys), (D, hidden),
                                            jnp.float32)).astype(jnp.bfloat16),
            "fc1_b": jnp.zeros((1, hidden), jnp.float32),
            "fc2_w": (s * jax.random.normal(next(keys), (hidden, D),
                                            jnp.float32)).astype(jnp.bfloat16),
            "fc2_b": jnp.zeros((1, D), jnp.float32),
        })
    return params


# ---------------------------------------------------------------------------
# VitExtractor forward
# ---------------------------------------------------------------------------

class VitExtractorPallas:
    """JAX/Pallas counterpart of the PyTorch VitExtractor (synthetic weights).

    Real DINOv2-L/14: embed_dim=1024, depth=24, num_heads=16, patch=14.  The
    same forward structure is kept at toy sizes suitable for a quick smoke test.
    TODO(synk): pretrained DINOv2 checkpoint weights and LayerScale cannot be
    reproduced without torch.hub access; structure, dtypes and shapes match.
    """

    def __init__(self, *, embed_dim=128, depth=2, num_heads=2, mlp_ratio=2.0,
                 patch_size=14, in_chans=3, img_hw=(28, 28), seed=0):
        self.patch_size = patch_size
        self.feature_dims = embed_dim
        self.num_heads = num_heads
        H, W = img_hw
        self.num_patches = (H // patch_size) * (W // patch_size)
        # ImageNet normalization constants (T.Normalize in the PyTorch module);
        # folded into the patch-embed weights inside init_vit_params.
        self.mean = jnp.array([0.485, 0.456, 0.406], jnp.float32)
        self.std = jnp.array([0.229, 0.224, 0.225], jnp.float32)
        self.params = init_vit_params(
            jax.random.PRNGKey(seed), embed_dim=embed_dim, depth=depth,
            num_heads=num_heads, mlp_ratio=mlp_ratio, patch_size=patch_size,
            in_chans=in_chans, num_patches=self.num_patches,
            mean=self.mean, std=self.std)
        self._forward = jax.jit(self._forward_impl)

    def __call__(self, input_img):
        return self._forward(input_img)

    def _forward_impl(self, input_img):
        B, C, H, W = input_img.shape
        ps = self.patch_size
        D = self.feature_dims
        nh = self.num_heads
        Hp, Wp = H // ps, W // ps
        Np = Hp * Wp
        N = Np + 1
        Npad = _round_up(N, 8)
        p = self.params

        # 1+2) preprocess + patch embed: the normalize is folded into the GEMM
        # weights, so raw pixels feed one matmul.  Patch extraction is pure
        # layout glue (reshape / transpose / pad).
        K = C * ps * ps
        Kpad = p["patch_w"].shape[0]
        patches = input_img.reshape(B, C, Hp, ps, Wp, ps)
        patches = patches.transpose(0, 2, 4, 1, 3, 5).reshape(B * Np, K)
        Mraw = B * Np
        tm = _round_up(Mraw, 8) if Mraw <= 512 else 512   # mem-bound GEMM: big tiles
        Mpad = _round_up(Mraw, tm)
        patches = jnp.pad(patches, ((0, Mpad - Mraw), (0, Kpad - K)))
        tok = patch_embed(patches, p["patch_w"], p["patch_b"], tm=tm)
        tok = tok[:Mraw].reshape(B, Np, D)

        # 3) prepend CLS token + positional embedding (layout glue + tiny add),
        # pad sequence to a sublane multiple; padded keys masked in-kernel.
        # Residual stream stays f32 between blocks (matches the fp32 torch ref).
        cls = jnp.broadcast_to(p["cls_token"], (B, 1, D))
        x_tok = jnp.concatenate([cls, tok], axis=1) + p["pos_embed"]  # (B, N, D)
        x_tok = jnp.pad(x_tok, ((0, 0), (0, Npad - N), (0, 0)))

        # 4) fused transformer blocks — exactly one pallas_call per block
        # TODO(synk): at real depth/size, prefetch block l+1 weights cross-call.
        for blk in p["blocks"]:
            x_tok = transformer_block(x_tok, blk, nh=nh, n_valid=N)

        # 5+6) final LayerNorm fused with CLS-drop + transpose(1, 2); trailing
        # reshape to (B, D, Hp, Wp) is a free contiguous-layout change.
        x_norm_t = final_norm_transpose(x_tok, p["norm"], n_valid=N)  # (B, D, Np)
        return x_norm_t.reshape(B, D, Hp, Wp)


if __name__ == "__main__":
    # Small deterministic example consistent with the module's forward:
    # B=2, C=3 (RGB, required by the ImageNet normalize), H=W=28 -> 2x2 patches.
    B, C, H, W = 2, 3, 28, 28
    key = jax.random.PRNGKey(0)
    input_img = jax.random.uniform(key, (B, C, H, W), dtype=jnp.float32)

    extractor = VitExtractorPallas(img_hw=(H, W), seed=0)
    out = jax.block_until_ready(extractor(input_img))

    expected_shape = (B, extractor.feature_dims,
                      H // extractor.patch_size, W // extractor.patch_size)
    assert out.shape == expected_shape, (out.shape, expected_shape)
    assert out.dtype == jnp.float32
    assert bool(jnp.all(jnp.isfinite(out)))
    print("KERNEL_OK")
</pallas_src>

<mosaic_0001>
module attributes {stable_mosaic.version = 11 : i64} {
  func.func @_patch_embed_kernel(%arg0: i32, %arg1: memref<8x640xf32, #tpu.memory_space<vmem>>, %arg2: memref<640x128xbf16, #tpu.memory_space<vmem>>, %arg3: memref<1x128xf32, #tpu.memory_space<vmem>>, %arg4: memref<8x128xf32, #tpu.memory_space<vmem>>) attributes {dimension_semantics = [#tpu.dimension_semantics<parallel>], iteration_bounds = array<i64: 1>, scalar_prefetch = 0 : i64, scratch_operands = 0 : i64, tpu.core_type = #tpu.core_type<tc>, window_params = [{transform_indices = @transform_0, window_bounds = array<i64: 8, 640>}, {pipeline_mode = #tpu.pipeline_mode<synchronous>, transform_indices = @transform_1, window_bounds = array<i64: 640, 128>}, {pipeline_mode = #tpu.pipeline_mode<synchronous>, transform_indices = @transform_2, window_bounds = array<i64: 1, 128>}, {transform_indices = @transform_3, window_bounds = array<i64: 8, 128>}]} {
    %c0 = arith.constant 0 : index
    %c0_0 = arith.constant 0 : index
    %0 = vector.load %arg1[%c0, %c0_0] : memref<8x640xf32, #tpu.memory_space<vmem>>, vector<8x640xf32>
    %1 = arith.truncf %0 : vector<8x640xf32> to vector<8x640xbf16>
    %c0_1 = arith.constant 0 : index
    %c0_2 = arith.constant 0 : index
    %2 = vector.load %arg2[%c0_1, %c0_2] : memref<640x128xbf16, #tpu.memory_space<vmem>>, vector<640x128xbf16>
    %cst = arith.constant dense<0.000000e+00> : vector<8x128xf32>
    %3 = tpu.matmul %1, %2, %cst {dimension_numbers = #tpu.dot_dimension_numbers<[1], [0], [0], [1], [0, 0, 1, 1], [], []>} : vector<8x640xbf16>, vector<640x128xbf16>, vector<8x128xf32> -> vector<8x128xf32>
    %c0_3 = arith.constant 0 : index
    %c0_4 = arith.constant 0 : index
    %4 = vector.load %arg3[%c0_3, %c0_4] : memref<1x128xf32, #tpu.memory_space<vmem>>, vector<1x128xf32>
    %5 = vector.broadcast %4 : vector<1x128xf32> to vector<8x128xf32>
    %6 = arith.addf %3, %5 : vector<8x128xf32>
    %c0_5 = arith.constant 0 : index
    %c0_6 = arith.constant 0 : index
    %7 = vector.load %arg4[%c0_5, %c0_6] : memref<8x128xf32, #tpu.memory_space<vmem>>, vector<8x128xf32>
    tpu.vector_store %arg4[%c0_5, %c0_6], %6 {strides = array<i32>} : memref<8x128xf32, #tpu.memory_space<vmem>>, vector<8x128xf32>,
    return
  }
  func.func @transform_0(%arg0: i32) -> (i32, i32) {
    %c0_i32 = arith.constant 0 : i32
    %c0_i32_0 = arith.constant 0 : i32
    return %arg0, %c0_i32 : i32, i32
  }
  func.func @transform_1(%arg0: i32) -> (i32, i32) {
    %c0_i32 = arith.constant 0 : i32
    %c0_i32_0 = arith.constant 0 : i32
    %c0_i32_1 = arith.constant 0 : i32
    return %c0_i32, %c0_i32_0 : i32, i32
  }
  func.func @transform_2(%arg0: i32) -> (i32, i32) {
    %c0_i32 = arith.constant 0 : i32
    %c0_i32_0 = arith.constant 0 : i32
    %c0_i32_1 = arith.constant 0 : i32
    return %c0_i32, %c0_i32_0 : i32, i32
  }
  func.func @transform_3(%arg0: i32) -> (i32, i32) {
    %c0_i32 = arith.constant 0 : i32
    %c0_i32_0 = arith.constant 0 : i32
    return %arg0, %c0_i32 : i32, i32
  }
}

module attributes {stable_mosaic.version = 11 : i64} {
  func.func @_final_norm_kernel(%arg0: i32, %arg1: memref<1x8x128xf32, #tpu.memory_space<vmem>>, %arg2: memref<2x128xf32, #tpu.memory_space<vmem>>, %arg3: memref<1x128x4xf32, #tpu.memory_space<vmem>>) attributes {dimension_semantics = [#tpu.dimension_semantics<parallel>], iteration_bounds = array<i64: 2>, scalar_prefetch = 0 : i64, scratch_operands = 0 : i64, tpu.core_type = #tpu.core_type<tc>, window_params = [{transform_indices = @transform_0, window_bounds = array<i64: 1, 8, 128>}, {pipeline_mode = #tpu.pipeline_mode<synchronous>, transform_indices = @transform_1, window_bounds = array<i64: 2, 128>}, {transform_indices = @transform_2, window_bounds = array<i64: 1, 128, 4>}]} {
    %c0 = arith.constant 0 : index
    %c0_0 = arith.constant 0 : index
    %c0_1 = arith.constant 0 : index
    %0 = vector.load %arg1[%c0, %c0_0, %c0_1] : memref<1x8x128xf32, #tpu.memory_space<vmem>>, vector<1x8x128xf32>
    %1 = vector.shape_cast %0 : vector<1x8x128xf32> to vector<8x128xf32>
    %c0_2 = arith.constant 0 : index
    %c0_3 = arith.constant 0 : index
    %2 = vector.load %arg2[%c0_2, %c0_3] : memref<2x128xf32, #tpu.memory_space<vmem>>, vector<2x128xf32>
    %cst = arith.constant dense<0.000000e+00> : vector<8xf32>
    %3 = vector.multi_reduction <add>, %1, %cst [1] : vector<8x128xf32> to vector<8xf32>
    %4 = vector.shape_cast %3 : vector<8xf32> to vector<8x1xf32>
    %cst_4 = arith.constant 1.280000e+02 : f32
    %5 = vector.broadcast %cst_4 : f32 to vector<8x1xf32>
    %6 = arith.divf %4, %5 : vector<8x1xf32>
    %7 = vector.broadcast %6 : vector<8x1xf32> to vector<8x128xf32>
    %8 = arith.subf %1, %7 : vector<8x128xf32>
    %9 = arith.mulf %8, %8 : vector<8x128xf32>
    %cst_5 = arith.constant dense<0.000000e+00> : vector<8xf32>
    %10 = vector.multi_reduction <add>, %9, %cst_5 [1] : vector<8x128xf32> to vector<8xf32>
    %11 = vector.shape_cast %10 : vector<8xf32> to vector<8x1xf32>
    %cst_6 = arith.constant 1.280000e+02 : f32
    %12 = vector.broadcast %cst_6 : f32 to vector<8x1xf32>
    %13 = arith.divf %11, %12 : vector<8x1xf32>
    %cst_7 = arith.constant 9.99999997E-7 : f32
    %14 = vector.broadcast %cst_7 : f32 to vector<8x1xf32>
    %15 = arith.addf %13, %14 : vector<8x1xf32>
    %16 = math.rsqrt %15 : vector<8x1xf32>
    %17 = vector.broadcast %16 : vector<8x1xf32> to vector<8x128xf32>
    %18 = arith.mulf %8, %17 : vector<8x128xf32>
    %19 = vector.extract_strided_slice %2 {offsets = [0, 0], sizes = [1, 128], strides = [1, 1]} : vector<2x128xf32> to vector<1x128xf32>
    %20 = vector.broadcast %19 : vector<1x128xf32> to vector<8x128xf32>
    %21 = arith.mulf %18, %20 : vector<8x128xf32>
    %22 = vector.extract_strided_slice %2 {offsets = [1, 0], sizes = [1, 128], strides = [1, 1]} : vector<2x128xf32> to vector<1x128xf32>
    %23 = vector.broadcast %22 : vector<1x128xf32> to vector<8x128xf32>
    %24 = arith.addf %21, %23 : vector<8x128xf32>
    %25 = tpu.transpose %24, [1, 0] : vector<8x128xf32> -> vector<128x8xf32>
    %26 = vector.extract_strided_slice %25 {offsets = [0, 1], sizes = [128, 4], strides = [1, 1]} : vector<128x8xf32> to vector<128x4xf32>
    %c0_8 = arith.constant 0 : index
    %c0_9 = arith.constant 0 : index
    %c0_10 = arith.constant 0 : index
    %27 = vector.load %arg3[%c0_8, %c0_9, %c0_10] : memref<1x128x4xf32, #tpu.memory_space<vmem>>, vector<1x128x4xf32>
    %28 = vector.shape_cast %27 : vector<1x128x4xf32> to vector<128x4xf32>
    %29 = vector.shape_cast %26 : vector<128x4xf32> to vector<1x128x4xf32>
    tpu.vector_store %arg3[%c0_8, %c0_9, %c0_10], %29 {strides = array<i32>} : memref<1x128x4xf32, #tpu.memory_space<vmem>>, vector<1x128x4xf32>,
    return
  }
  func.func @transform_0(%arg0: i32) -> (i32, i32, i32) {
    %c0_i32 = arith.constant 0 : i32
    %c0_i32_0 = arith.constant 0 : i32
    %c0_i32_1 = arith.constant 0 : i32
    return %arg0, %c0_i32, %c0_i32_0 : i32, i32, i32
  }
  func.func @transform_1(%arg0: i32) -> (i32, i32) {
    %c0_i32 = arith.constant 0 : i32
    %c0_i32_0 = arith.constant 0 : i32
    %c0_i32_1 = arith.constant 0 : i32
    return %c0_i32, %c0_i32_0 : i32, i32
  }
  func.func @transform_2(%arg0: i32) -> (i32, i32, i32) {
    %c0_i32 = arith.constant 0 : i32
    %c0_i32_0 = arith.constant 0 : i32
    %c0_i32_1 = arith.constant 0 : i32
    return %arg0, %c0_i32, %c0_i32_0 : i32, i32, i32
  }
}

module attributes {stable_mosaic.version = 11 : i64} {
  func.func @_block_kernel(%arg0: i32, %arg1: memref<1x8x128xf32, #tpu.memory_space<vmem>>, %arg2: memref<2x128xf32, #tpu.memory_space<vmem>>, %arg3: memref<128x384xbf16, #tpu.memory_space<vmem>>, %arg4: memref<1x384xf32, #tpu.memory_space<vmem>>, %arg5: memref<128x128xbf16, #tpu.memory_space<vmem>>, %arg6: memref<1x128xf32, #tpu.memory_space<vmem>>, %arg7: memref<2x128xf32, #tpu.memory_space<vmem>>, %arg8: memref<128x256xbf16, #tpu.memory_space<vmem>>, %arg9: memref<1x256xf32, #tpu.memory_space<vmem>>, %arg10: memref<256x128xbf16, #tpu.memory_space<vmem>>, %arg11: memref<1x128xf32, #tpu.memory_space<vmem>>, %arg12: memref<1x8x128xf32, #tpu.memory_space<vmem>>) attributes {dimension_semantics = [#tpu.dimension_semantics<parallel>], iteration_bounds = array<i64: 2>, scalar_prefetch = 0 : i64, scratch_operands = 0 : i64, tpu.core_type = #tpu.core_type<tc>, window_params = [{transform_indices = @transform_0, window_bounds = array<i64: 1, 8, 128>}, {pipeline_mode = #tpu.pipeline_mode<synchronous>, transform_indices = @transform_1, window_bounds = array<i64: 2, 128>}, {pipeline_mode = #tpu.pipeline_mode<synchronous>, transform_indices = @transform_2, window_bounds = array<i64: 128, 384>}, {pipeline_mode = #tpu.pipeline_mode<synchronous>, transform_indices = @transform_3, window_bounds = array<i64: 1, 384>}, {pipeline_mode = #tpu.pipeline_mode<synchronous>, transform_indices = @transform_4, window_bounds = array<i64: 128, 128>}, {pipeline_mode = #tpu.pipeline_mode<synchronous>, transform_indices = @transform_5, window_bounds = array<i64: 1, 128>}, {pipeline_mode = #tpu.pipeline_mode<synchronous>, transform_indices = @transform_6, window_bounds = array<i64: 2, 128>}, {pipeline_mode = #tpu.pipeline_mode<synchronous>, transform_indices = @transform_7, window_bounds = array<i64: 128, 256>}, {pipeline_mode = #tpu.pipeline_mode<synchronous>, transform_indices = @transform_8, window_bounds = array<i64: 1, 256>}, {pipeline_mode = #tpu.pipeline_mode<synchronous>, transform_indices = @transform_9, window_bounds = array<i64: 256, 128>}, {pipeline_mode = #tpu.pipeline_mode<synchronous>, transform_indices = @transform_10, window_bounds = array<i64: 1, 128>}, {transform_indices = @transform_11, window_bounds = array<i64: 1, 8, 128>}]} {
    %c0 = arith.constant 0 : index
    %c0_0 = arith.constant 0 : index
    %c0_1 = arith.constant 0 : index
    %0 = vector.load %arg1[%c0, %c0_0, %c0_1] : memref<1x8x128xf32, #tpu.memory_space<vmem>>, vector<1x8x128xf32>
    %1 = vector.shape_cast %0 : vector<1x8x128xf32> to vector<8x128xf32>
    %2 = tpu.iota {dimensions = array<i32: 1>} : vector<1x8xi32>
    %c5_i32 = arith.constant 5 : i32
    %3 = vector.broadcast %c5_i32 : i32 to vector<1x8xi32>
    %4 = arith.cmpi slt, %2, %3 : vector<1x8xi32>
    %cst = arith.constant 0.000000e+00 : f32
    %cst_2 = arith.constant -1.000000e+30 : f32
    %5 = vector.broadcast %cst : f32 to vector<1x8xf32>
    %6 = vector.broadcast %cst_2 : f32 to vector<1x8xf32>
    %7 = arith.select %4, %5, %6 : vector<1x8xi1>, vector<1x8xf32>
    %c0_3 = arith.constant 0 : index
    %c0_4 = arith.constant 0 : index
    %8 = vector.load %arg2[%c0_3, %c0_4] : memref<2x128xf32, #tpu.memory_space<vmem>>, vector<2x128xf32>
    %cst_5 = arith.constant dense<0.000000e+00> : vector<8xf32>
    %9 = vector.multi_reduction <add>, %1, %cst_5 [1] : vector<8x128xf32> to vector<8xf32>
    %10 = vector.shape_cast %9 : vector<8xf32> to vector<8x1xf32>
    %cst_6 = arith.constant 1.280000e+02 : f32
    %11 = vector.broadcast %cst_6 : f32 to vector<8x1xf32>
    %12 = arith.divf %10, %11 : vector<8x1xf32>
    %13 = vector.broadcast %12 : vector<8x1xf32> to vector<8x128xf32>
    %14 = arith.subf %1, %13 : vector<8x128xf32>
    %15 = arith.mulf %14, %14 : vector<8x128xf32>
    %cst_7 = arith.constant dense<0.000000e+00> : vector<8xf32>
    %16 = vector.multi_reduction <add>, %15, %cst_7 [1] : vector<8x128xf32> to vector<8xf32>
    %17 = vector.shape_cast %16 : vector<8xf32> to vector<8x1xf32>
    %cst_8 = arith.constant 1.280000e+02 : f32
    %18 = vector.broadcast %cst_8 : f32 to vector<8x1xf32>
    %19 = arith.divf %17, %18 : vector<8x1xf32>
    %cst_9 = arith.constant 9.99999997E-7 : f32
    %20 = vector.broadcast %cst_9 : f32 to vector<8x1xf32>
    %21 = arith.addf %19, %20 : vector<8x1xf32>
    %22 = math.rsqrt %21 : vector<8x1xf32>
    %23 = vector.broadcast %22 : vector<8x1xf32> to vector<8x128xf32>
    %24 = arith.mulf %14, %23 : vector<8x128xf32>
    %25 = vector.extract_strided_slice %8 {offsets = [0, 0], sizes = [1, 128], strides = [1, 1]} : vector<2x128xf32> to vector<1x128xf32>
    %26 = vector.broadcast %25 : vector<1x128xf32> to vector<8x128xf32>
    %27 = arith.mulf %24, %26 : vector<8x128xf32>
    %28 = vector.extract_strided_slice %8 {offsets = [1, 0], sizes = [1, 128], strides = [1, 1]} : vector<2x128xf32> to vector<1x128xf32>
    %29 = vector.broadcast %28 : vector<1x128xf32> to vector<8x128xf32>
    %30 = arith.addf %27, %29 : vector<8x128xf32>
    %31 = arith.truncf %30 : vector<8x128xf32> to vector<8x128xbf16>
    %c0_10 = arith.constant 0 : index
    %c0_11 = arith.constant 0 : index
    %32 = vector.load %arg3[%c0_10, %c0_11] : memref<128x384xbf16, #tpu.memory_space<vmem>>, vector<128x384xbf16>
    %cst_12 = arith.constant dense<0.000000e+00> : vector<8x384xf32>
    %33 = tpu.matmul %31, %32, %cst_12 {dimension_numbers = #tpu.dot_dimension_numbers<[1], [0], [0], [1], [0, 0, 1, 1], [], []>} : vector<8x128xbf16>, vector<128x384xbf16>, vector<8x384xf32> -> vector<8x384xf32>
    %c0_13 = arith.constant 0 : index
    %c0_14 = arith.constant 0 : index
    %34 = vector.load %arg4[%c0_13, %c0_14] : memref<1x384xf32, #tpu.memory_space<vmem>>, vector<1x384xf32>
    %35 = vector.broadcast %34 : vector<1x384xf32> to vector<8x384xf32>
    %36 = arith.addf %33, %35 : vector<8x384xf32>
    %37 = arith.truncf %36 : vector<8x384xf32> to vector<8x384xbf16>
    %38 = vector.extract_strided_slice %37 {offsets = [0, 0], sizes = [8, 64], strides = [1, 1]} : vector<8x384xbf16> to vector<8x64xbf16>
    %39 = vector.extract_strided_slice %37 {offsets = [0, 128], sizes = [8, 64], strides = [1, 1]} : vector<8x384xbf16> to vector<8x64xbf16>
    %40 = vector.extract_strided_slice %37 {offsets = [0, 256], sizes = [8, 64], strides = [1, 1]} : vector<8x384xbf16> to vector<8x64xbf16>
    %cst_15 = arith.constant dense<0.000000e+00> : vector<8x8xf32>
    %41 = tpu.matmul %38, %39, %cst_15 {dimension_numbers = #tpu.dot_dimension_numbers<[1], [1], [0], [0], [0, 0, 1, 0], [], []>} : vector<8x64xbf16>, vector<8x64xbf16>, vector<8x8xf32> -> vector<8x8xf32>
    %42 = vector.broadcast %7 : vector<1x8xf32> to vector<8x8xf32>
    %43 = arith.addf %41, %42 : vector<8x8xf32>
    %cst_16 = arith.constant dense<0xFF800000> : vector<8xf32>
    %44 = vector.multi_reduction <maximumf>, %43, %cst_16 [1] : vector<8x8xf32> to vector<8xf32>
    %45 = vector.shape_cast %44 : vector<8xf32> to vector<8x1xf32>
    %46 = vector.broadcast %45 : vector<8x1xf32> to vector<8x8xf32>
    %47 = arith.subf %43, %46 : vector<8x8xf32>
    %48 = math.exp %47 : vector<8x8xf32>
    %cst_17 = arith.constant dense<0.000000e+00> : vector<8xf32>
    %49 = vector.multi_reduction <add>, %48, %cst_17 [1] : vector<8x8xf32> to vector<8xf32>
    %50 = vector.shape_cast %49 : vector<8xf32> to vector<8x1xf32>
    %51 = arith.truncf %48 : vector<8x8xf32> to vector<8x8xbf16>
    %cst_18 = arith.constant dense<0.000000e+00> : vector<8x64xf32>
    %52 = tpu.matmul %51, %40, %cst_18 {dimension_numbers = #tpu.dot_dimension_numbers<[1], [0], [0], [1], [0, 0, 1, 1], [], []>} : vector<8x8xbf16>, vector<8x64xbf16>, vector<8x64xf32> -> vector<8x64xf32>
    %53 = tpu.reciprocal %50 {approx = true} : vector<8x1xf32> -> vector<8x1xf32>
    %54 = vector.broadcast %53 : vector<8x1xf32> to vector<8x64xf32>
    %55 = arith.mulf %52, %54 : vector<8x64xf32>
    %56 = vector.extract_strided_slice %37 {offsets = [0, 64], sizes = [8, 64], strides = [1, 1]} : vector<8x384xbf16> to vector<8x64xbf16>
    %57 = vector.extract_strided_slice %37 {offsets = [0, 192], sizes = [8, 64], strides = [1, 1]} : vector<8x384xbf16> to vector<8x64xbf16>
    %58 = vector.extract_strided_slice %37 {offsets = [0, 320], sizes = [8, 64], strides = [1, 1]} : vector<8x384xbf16> to vector<8x64xbf16>
    %cst_19 = arith.constant dense<0.000000e+00> : vector<8x8xf32>
    %59 = tpu.matmul %56, %57, %cst_19 {dimension_numbers = #tpu.dot_dimension_numbers<[1], [1], [0], [0], [0, 0, 1, 0], [], []>} : vector<8x64xbf16>, vector<8x64xbf16>, vector<8x8xf32> -> vector<8x8xf32>
    %60 = vector.broadcast %7 : vector<1x8xf32> to vector<8x8xf32>
    %61 = arith.addf %59, %60 : vector<8x8xf32>
    %cst_20 = arith.constant dense<0xFF800000> : vector<8xf32>
    %62 = vector.multi_reduction <maximumf>, %61, %cst_20 [1] : vector<8x8xf32> to vector<8xf32>
    %63 = vector.shape_cast %62 : vector<8xf32> to vector<8x1xf32>
    %64 = vector.broadcast %63 : vector<8x1xf32> to vector<8x8xf32>
    %65 = arith.subf %61, %64 : vector<8x8xf32>
    %66 = math.exp %65 : vector<8x8xf32>
    %cst_21 = arith.constant dense<0.000000e+00> : vector<8xf32>
    %67 = vector.multi_reduction <add>, %66, %cst_21 [1] : vector<8x8xf32> to vector<8xf32>
    %68 = vector.shape_cast %67 : vector<8xf32> to vector<8x1xf32>
    %69 = arith.truncf %66 : vector<8x8xf32> to vector<8x8xbf16>
    %cst_22 = arith.constant dense<0.000000e+00> : vector<8x64xf32>
    %70 = tpu.matmul %69, %58, %cst_22 {dimension_numbers = #tpu.dot_dimension_numbers<[1], [0], [0], [1], [0, 0, 1, 1], [], []>} : vector<8x8xbf16>, vector<8x64xbf16>, vector<8x64xf32> -> vector<8x64xf32>
    %71 = tpu.reciprocal %68 {approx = true} : vector<8x1xf32> -> vector<8x1xf32>
    %72 = vector.broadcast %71 : vector<8x1xf32> to vector<8x64xf32>
    %73 = arith.mulf %70, %72 : vector<8x64xf32>
    %74 = tpu.concatenate %55, %73 in 1 : vector<8x64xf32>, vector<8x64xf32> -> vector<8x128xf32>
    %75 = arith.truncf %74 : vector<8x128xf32> to vector<8x128xbf16>
    %c0_23 = arith.constant 0 : index
    %c0_24 = arith.constant 0 : index
    %76 = vector.load %arg5[%c0_23, %c0_24] : memref<128x128xbf16, #tpu.memory_space<vmem>>, vector<128x128xbf16>
    %cst_25 = arith.constant dense<0.000000e+00> : vector<8x128xf32>
    %77 = tpu.matmul %75, %76, %cst_25 {dimension_numbers = #tpu.dot_dimension_numbers<[1], [0], [0], [1], [0, 0, 1, 1], [], []>} : vector<8x128xbf16>, vector<128x128xbf16>, vector<8x128xf32> -> vector<8x128xf32>
    %c0_26 = arith.constant 0 : index
    %c0_27 = arith.constant 0 : index
    %78 = vector.load %arg6[%c0_26, %c0_27] : memref<1x128xf32, #tpu.memory_space<vmem>>, vector<1x128xf32>
    %79 = vector.broadcast %78 : vector<1x128xf32> to vector<8x128xf32>
    %80 = arith.addf %77, %79 : vector<8x128xf32>
    %81 = arith.addf %1, %80 : vector<8x128xf32>
    %c0_28 = arith.constant 0 : index
    %c0_29 = arith.constant 0 : index
    %82 = vector.load %arg7[%c0_28, %c0_29] : memref<2x128xf32, #tpu.memory_space<vmem>>, vector<2x128xf32>
    %cst_30 = arith.constant dense<0.000000e+00> : vector<8xf32>
    %83 = vector.multi_reduction <add>, %81, %cst_30 [1] : vector<8x128xf32> to vector<8xf32>
    %84 = vector.shape_cast %83 : vector<8xf32> to vector<8x1xf32>
    %cst_31 = arith.constant 1.280000e+02 : f32
    %85 = vector.broadcast %cst_31 : f32 to vector<8x1xf32>
    %86 = arith.divf %84, %85 : vector<8x1xf32>
    %87 = vector.broadcast %86 : vector<8x1xf32> to vector<8x128xf32>
    %88 = arith.subf %81, %87 : vector<8x128xf32>
    %89 = arith.mulf %88, %88 : vector<8x128xf32>
    %cst_32 = arith.constant dense<0.000000e+00> : vector<8xf32>
    %90 = vector.multi_reduction <add>, %89, %cst_32 [1] : vector<8x128xf32> to vector<8xf32>
    %91 = vector.shape_cast %90 : vector<8xf32> to vector<8x1xf32>
    %cst_33 = arith.constant 1.280000e+02 : f32
    %92 = vector.broadcast %cst_33 : f32 to vector<8x1xf32>
    %93 = arith.divf %91, %92 : vector<8x1xf32>
    %cst_34 = arith.constant 9.99999997E-7 : f32
    %94 = vector.broadcast %cst_34 : f32 to vector<8x1xf32>
    %95 = arith.addf %93, %94 : vector<8x1xf32>
    %96 = math.rsqrt %95 : vector<8x1xf32>
    %97 = vector.broadcast %96 : vector<8x1xf32> to vector<8x128xf32>
    %98 = arith.mulf %88, %97 : vector<8x128xf32>
    %99 = vector.extract_strided_slice %82 {offsets = [0, 0], sizes = [1, 128], strides = [1, 1]} : vector<2x128xf32> to vector<1x128xf32>
    %100 = vector.broadcast %99 : vector<1x128xf32> to vector<8x128xf32>
    %101 = arith.mulf %98, %100 : vector<8x128xf32>
    %102 = vector.extract_strided_slice %82 {offsets = [1, 0], sizes = [1, 128], strides = [1, 1]} : vector<2x128xf32> to vector<1x128xf32>
    %103 = vector.broadcast %102 : vector<1x128xf32> to vector<8x128xf32>
    %104 = arith.addf %101, %103 : vector<8x128xf32>
    %105 = arith.truncf %104 : vector<8x128xf32> to vector<8x128xbf16>
    %c0_35 = arith.constant 0 : index
    %c0_36 = arith.constant 0 : index
    %106 = vector.load %arg8[%c0_35, %c0_36] : memref<128x256xbf16, #tpu.memory_space<vmem>>, vector<128x256xbf16>
    %cst_37 = arith.constant dense<0.000000e+00> : vector<8x256xf32>
    %107 = tpu.matmul %105, %106, %cst_37 {dimension_numbers = #tpu.dot_dimension_numbers<[1], [0], [0], [1], [0, 0, 1, 1], [], []>} : vector<8x128xbf16>, vector<128x256xbf16>, vector<8x256xf32> -> vector<8x256xf32>
    %c0_38 = arith.constant 0 : index
    %c0_39 = arith.constant 0 : index
    %108 = vector.load %arg9[%c0_38, %c0_39] : memref<1x256xf32, #tpu.memory_space<vmem>>, vector<1x256xf32>
    %109 = vector.broadcast %108 : vector<1x256xf32> to vector<8x256xf32>
    %110 = arith.addf %107, %109 : vector<8x256xf32>
    %cst_40 = arith.constant 5.000000e-01 : f32
    %111 = vector.broadcast %cst_40 : f32 to vector<8x256xf32>
    %112 = arith.mulf %111, %110 : vector<8x256xf32>
    %cst_41 = arith.constant 0.707106769 : f32
    %113 = vector.broadcast %cst_41 : f32 to vector<8x256xf32>
    %114 = arith.mulf %110, %113 : vector<8x256xf32>
    %115 = math.absf %114 : vector<8x256xf32>
    %cst_42 = arith.constant 0.327591091 : f32
    %116 = vector.broadcast %cst_42 : f32 to vector<8x256xf32>
    %117 = arith.mulf %116, %115 : vector<8x256xf32>
    %cst_43 = arith.constant 1.000000e+00 : f32
    %118 = vector.broadcast %cst_43 : f32 to vector<8x256xf32>
    %119 = arith.addf %118, %117 : vector<8x256xf32>
    %120 = tpu.reciprocal %119 {approx = true} : vector<8x256xf32> -> vector<8x256xf32>
    %cst_44 = arith.constant 1.06140542 : f32
    %121 = vector.broadcast %cst_44 : f32 to vector<8x256xf32>
    %122 = arith.mulf %121, %120 : vector<8x256xf32>
    %cst_45 = arith.constant -1.45315206 : f32
    %123 = vector.broadcast %cst_45 : f32 to vector<8x256xf32>
    %124 = arith.addf %122, %123 : vector<8x256xf32>
    %125 = arith.mulf %124, %120 : vector<8x256xf32>
    %cst_46 = arith.constant 1.42141378 : f32
    %126 = vector.broadcast %cst_46 : f32 to vector<8x256xf32>
    %127 = arith.addf %125, %126 : vector<8x256xf32>
    %128 = arith.mulf %127, %120 : vector<8x256xf32>
    %cst_47 = arith.constant -0.284496725 : f32
    %129 = vector.broadcast %cst_47 : f32 to vector<8x256xf32>
    %130 = arith.addf %128, %129 : vector<8x256xf32>
    %131 = arith.mulf %130, %120 : vector<8x256xf32>
    %cst_48 = arith.constant 0.254829586 : f32
    %132 = vector.broadcast %cst_48 : f32 to vector<8x256xf32>
    %133 = arith.addf %131, %132 : vector<8x256xf32>
    %134 = arith.mulf %133, %120 : vector<8x256xf32>
    %cst_49 = arith.constant 0.000000e+00 : f32
    %135 = vector.broadcast %cst_49 : f32 to vector<8x256xf32>
    %136 = arith.subf %135, %115 : vector<8x256xf32>
    %137 = arith.mulf %136, %115 : vector<8x256xf32>
    %138 = math.exp %137 : vector<8x256xf32>
    %139 = arith.mulf %134, %138 : vector<8x256xf32>
    %cst_50 = arith.constant 1.000000e+00 : f32
    %140 = vector.broadcast %cst_50 : f32 to vector<8x256xf32>
    %141 = arith.subf %140, %139 : vector<8x256xf32>
    %cst_51 = arith.constant 0.000000e+00 : f32
    %142 = vector.broadcast %cst_51 : f32 to vector<8x256xf32>
    %143 = arith.cmpf olt, %114, %142 : vector<8x256xf32>
    %cst_52 = arith.constant 0.000000e+00 : f32
    %144 = vector.broadcast %cst_52 : f32 to vector<8x256xf32>
    %145 = arith.subf %144, %141 : vector<8x256xf32>
    %146 = arith.select %143, %145, %141 : vector<8x256xi1>, vector<8x256xf32>
    %cst_53 = arith.constant 1.000000e+00 : f32
    %147 = vector.broadcast %cst_53 : f32 to vector<8x256xf32>
    %148 = arith.addf %147, %146 : vector<8x256xf32>
    %149 = arith.mulf %112, %148 : vector<8x256xf32>
    %150 = arith.truncf %149 : vector<8x256xf32> to vector<8x256xbf16>
    %c0_54 = arith.constant 0 : index
    %c0_55 = arith.constant 0 : index
    %151 = vector.load %arg10[%c0_54, %c0_55] : memref<256x128xbf16, #tpu.memory_space<vmem>>, vector<256x128xbf16>
    %cst_56 = arith.constant dense<0.000000e+00> : vector<8x128xf32>
    %152 = tpu.matmul %150, %151, %cst_56 {dimension_numbers = #tpu.dot_dimension_numbers<[1], [0], [0], [1], [0, 0, 1, 1], [], []>} : vector<8x256xbf16>, vector<256x128xbf16>, vector<8x128xf32> -> vector<8x128xf32>
    %c0_57 = arith.constant 0 : index
    %c0_58 = arith.constant 0 : index
    %153 = vector.load %arg11[%c0_57, %c0_58] : memref<1x128xf32, #tpu.memory_space<vmem>>, vector<1x128xf32>
    %154 = vector.broadcast %153 : vector<1x128xf32> to vector<8x128xf32>
    %155 = arith.addf %152, %154 : vector<8x128xf32>
    %156 = arith.addf %81, %155 : vector<8x128xf32>
    %c0_59 = arith.constant 0 : index
    %c0_60 = arith.constant 0 : index
    %c0_61 = arith.constant 0 : index
    %157 = vector.load %arg12[%c0_59, %c0_60, %c0_61] : memref<1x8x128xf32, #tpu.memory_space<vmem>>, vector<1x8x128xf32>
    %158 = vector.shape_cast %157 : vector<1x8x128xf32> to vector<8x128xf32>
    %159 = vector.shape_cast %156 : vector<8x128xf32> to vector<1x8x128xf32>
    tpu.vector_store %arg12[%c0_59, %c0_60, %c0_61], %159 {strides = array<i32>} : memref<1x8x128xf32, #tpu.memory_space<vmem>>, vector<1x8x128xf32>,
    return
  }
  func.func @transform_0(%arg0: i32) -> (i32, i32, i32) {
    %c0_i32 = arith.constant 0 : i32
    %c0_i32_0 = arith.constant 0 : i32
    %c0_i32_1 = arith.constant 0 : i32
    return %arg0, %c0_i32, %c0_i32_0 : i32, i32, i32
  }
  func.func @transform_1(%arg0: i32) -> (i32, i32) {
    %c0_i32 = arith.constant 0 : i32
    %c0_i32_0 = arith.constant 0 : i32
    %c0_i32_1 = arith.constant 0 : i32
    return %c0_i32, %c0_i32_0 : i32, i32
  }
  func.func @transform_2(%arg0: i32) -> (i32, i32) {
    %c0_i32 = arith.constant 0 : i32
    %c0_i32_0 = arith.constant 0 : i32
    %c0_i32_1 = arith.constant 0 : i32
    return %c0_i32, %c0_i32_0 : i32, i32
  }
  func.func @transform_3(%arg0: i32) -> (i32, i32) {
    %c0_i32 = arith.constant 0 : i32
    %c0_i32_0 = arith.constant 0 : i32
    %c0_i32_1 = arith.constant 0 : i32
    return %c0_i32, %c0_i32_0 : i32, i32
  }
  func.func @transform_4(%arg0: i32) -> (i32, i32) {
    %c0_i32 = arith.constant 0 : i32
    %c0_i32_0 = arith.constant 0 : i32
    %c0_i32_1 = arith.constant 0 : i32
    return %c0_i32, %c0_i32_0 : i32, i32
  }
  func.func @transform_5(%arg0: i32) -> (i32, i32) {
    %c0_i32 = arith.constant 0 : i32
    %c0_i32_0 = arith.constant 0 : i32
    %c0_i32_1 = arith.constant 0 : i32
    return %c0_i32, %c0_i32_0 : i32, i32
  }
  func.func @transform_6(%arg0: i32) -> (i32, i32) {
    %c0_i32 = arith.constant 0 : i32
    %c0_i32_0 = arith.constant 0 : i32
    %c0_i32_1 = arith.constant 0 : i32
    return %c0_i32, %c0_i32_0 : i32, i32
  }
  func.func @transform_7(%arg0: i32) -> (i32, i32) {
    %c0_i32 = arith.constant 0 : i32
    %c0_i32_0 = arith.constant 0 : i32
    %c0_i32_1 = arith.constant 0 : i32
    return %c0_i32, %c0_i32_0 : i32, i32
  }
  func.func @transform_8(%arg0: i32) -> (i32, i32) {
    %c0_i32 = arith.constant 0 : i32
    %c0_i32_0 = arith.constant 0 : i32
    %c0_i32_1 = arith.constant 0 : i32
    return %c0_i32, %c0_i32_0 : i32, i32
  }
  func.func @transform_9(%arg0: i32) -> (i32, i32) {
    %c0_i32 = arith.constant 0 : i32
    %c0_i32_0 = arith.constant 0 : i32
    %c0_i32_1 = arith.constant 0 : i32
    return %c0_i32, %c0_i32_0 : i32, i32
  }
  func.func @transform_10(%arg0: i32) -> (i32, i32) {
    %c0_i32 = arith.constant 0 : i32
    %c0_i32_0 = arith.constant 0 : i32
    %c0_i32_1 = arith.constant 0 : i32
    return %c0_i32, %c0_i32_0 : i32, i32
  }
  func.func @transform_11(%arg0: i32) -> (i32, i32, i32) {
    %c0_i32 = arith.constant 0 : i32
    %c0_i32_0 = arith.constant 0 : i32
    %c0_i32_1 = arith.constant 0 : i32
    return %arg0, %c0_i32, %c0_i32_0 : i32, i32, i32
  }
}

</mosaic_0001>

<bundles_post_ra>
// kernel: _forward_impl.4
= control target key start
LH: loop header
LB: loop body
LE: loop exit
PB: predicated region body
PF: predicated region fallthrough
CT: control target
= control target key end

     0   :  { %v633_v35 = vmov 0.0   ;;  %vm634_vm0 = vmmov 0   ;;  %s796_s1 = inlined_call_operand.vmem [shape: bf16[640,128], index: 1, kind: input, shape index: {}]   ;;  %s797_s0 = inlined_call_operand.vmem [shape: f32[8,640], index: 0, kind: input, shape index: {}]   ;;  %s798_s2 = inlined_call_operand.vmem [shape: f32[1,128], index: 2, kind: input, shape index: {}]   ;;  %s799_s3 = inlined_call_operand.vmem [shape: f32[8,128], index: 3, kind: output, shape index: {}]  }
   0x1   :  { %v593_v0 = vld [vmem:[%s796_s1 + $0x40] sm:$0xff]   ;;  %v597_v4 = vld [vmem:[%s796_s1 + $0x48] sm:$0xff]   ;;  %v601_v8 = vld [vmem:[%s796_s1 + $0x50] sm:$0xff]  }
   0x2   :  { %v594_v1 = vld [vmem:[%s796_s1] sm:$0xff]   ;;  %518 = vmatprep.subr.bf16.mxu0 %v593_v0  ;;  %v598_v5 = vld [vmem:[%s796_s1 + $0x8] sm:$0xff]   ;;  %v602_v9 = vld [vmem:[%s796_s1 + $0x10] sm:$0xff]  }
   0x3   :  { %v595_v2 = vld [vmem:[%s796_s1 + $0xc0] sm:$0xff]   ;;  %519 = vmatpush3.bf16.msra.mxu0 %v594_v1  ;;  %v599_v6 = vld [vmem:[%s796_s1 + $0xc8] sm:$0xff]   ;;  %v603_v10 = vld [vmem:[%s796_s1 + $0xd0] sm:$0xff]  }
   0x4   :  { %v596_v3 = vld [vmem:[%s796_s1 + $0x80] sm:$0xff]   ;;  %540 = vmatprep.subr.bf16.mxu1 %v595_v2  ;;  %520 = vmatprep.subr.bf16.mxu0 %v597_v4  ;;  %v600_v7 = vld [vmem:[%s796_s1 + $0x88] sm:$0xff]   ;;  %v604_v11 = vld [vmem:[%s796_s1 + $0x90] sm:$0xff]  }
   0x5   :  { %541 = vmatpush3.bf16.msra.mxu1 %v596_v3  ;;  %v605_v12 = vld [vmem:[%s796_s1 + $0x58] sm:$0xff]   ;;  %v609_v16 = vld [vmem:[%s796_s1 + $0x60] sm:$0xff]   ;;  %v613_v20 = vld [vmem:[%s796_s1 + $0x68] sm:$0xff]  }
   0x6   :  { %542 = vmatprep.subr.bf16.mxu1 %v599_v6  ;;  %v606_v13 = vld [vmem:[%s796_s1 + $0x18] sm:$0xff]   ;;  %v610_v17 = vld [vmem:[%s796_s1 + $0x20] sm:$0xff]   ;;  %v614_v21 = vld [vmem:[%s796_s1 + $0x28] sm:$0xff]  }
   0x7   :  { %521 = vmatpush3.bf16.msra.mxu0 %v598_v5  ;;  %v607_v14 = vld [vmem:[%s796_s1 + $0xd8] sm:$0xff]   ;;  %v611_v18 = vld [vmem:[%s796_s1 + $0xe0] sm:$0xff]   ;;  %v615_v22 = vld [vmem:[%s796_s1 + $0xe8] sm:$0xff]  }
   0x8   :  { %522 = vmatprep.subr.bf16.mxu0 %v601_v8  ;;  %v608_v15 = vld [vmem:[%s796_s1 + $0x98] sm:$0xff]   ;;  %v612_v19 = vld [vmem:[%s796_s1 + $0xa0] sm:$0xff]   ;;  %v616_v23 = vld [vmem:[%s796_s1 + $0xa8] sm:$0xff]  }
   0x9   :  { %543 = vmatpush3.bf16.msra.mxu1 %v600_v7  ;;  %v617_v24 = vld [vmem:[%s796_s1 + $0x70] sm:$0xff]   ;;  %v621_v28 = vld [vmem:[%s796_s1 + $0x78] sm:$0xff]   ;;  %v16_v31 = vld [vmem:[%s797_s0 + $0x8] sm:$0xff] }
   0xa   :  { %544 = vmatprep.subr.bf16.mxu1 %v603_v10  ;;  %v618_v25 = vld [vmem:[%s796_s1 + $0x30] sm:$0xff]   ;;  %v622_v29 = vld [vmem:[%s796_s1 + $0x38] sm:$0xff]   ;;  %v21_v32 = vpack.c.bf16 %v16_v31, %v16_v31  ;;  %v15_v34 = vld [vmem:[%s797_s0] sm:$0xff] }
   0xb   :  { %523 = vmatpush3.bf16.msra.mxu0 %v602_v9  ;;  %v619_v26 = vld [vmem:[%s796_s1 + $0xf0] sm:$0xff]   ;;  %v623_v30 = vld [vmem:[%s796_s1 + $0xf8] sm:$0xff]   ;;  %v20_v37 = vpack.c.bf16 %v15_v34, %v15_v34  ;;  %v625_v39 = vld [vmem:[%s796_s1 + $0x100] sm:$0xff]  }
   0xc   :  { %524 = vmatprep.subr.bf16.mxu0 %v605_v12  ;;  %v620_v27 = vld [vmem:[%s796_s1 + $0xb0] sm:$0xff]   ;;  %v624_v33 = vld [vmem:[%s796_s1 + $0xb8] sm:$0xff]   ;;  %384 = vmatprep.mubr.bf16.mxu0 %v21_v32  ;;  %v626_v42 = vld [vmem:[%s796_s1 + $0x108] sm:$0xff]  }
   0xd   :  { %545 = vmatpush3.bf16.msra.mxu1 %v604_v11  ;;  %v18_v36 = vld [vmem:[%s797_s0 + $0x18] sm:$0xff]  ;;  %v17_v40 = vld [vmem:[%s797_s0 + $0x10] sm:$0xff]  ;;  %v629_v45 = vld [vmem:[%s796_s1 + $0x120] sm:$0xff]  }
   0xe   :  { %546 = vmatprep.subr.bf16.mxu1 %v607_v14  ;;  %v23_v38 = vpack.c.bf16 %v18_v36, %v18_v36  ;;  %v22_v41 = vpack.c.bf16 %v17_v40, %v17_v40  ;;  %v627_v43 = vld [vmem:[%s796_s1 + $0x110] sm:$0xff]   ;;  %v628_v44 = vld [vmem:[%s796_s1 + $0x118] sm:$0xff]   ;;  %v630_v46 = vld [vmem:[%s796_s1 + $0x128] sm:$0xff]  }
   0xf   :  { %525 = vmatpush3.bf16.msra.mxu0 %v606_v13  ;;  %v631_v47 = vld [vmem:[%s796_s1 + $0x130] sm:$0xff]   ;;  %v632_v48 = vld [vmem:[%s796_s1 + $0x138] sm:$0xff]   ;;  %v19_v49 = vld [vmem:[%s797_s0 + $0x20] sm:$0xff] }
  0x10   :  { %526 = vmatprep.subr.bf16.mxu0 %v609_v16  ;;  %424 = vmatprep.mubr.bf16.mxu1 %v23_v38  ;;  %v24_v50 = vpack.c.bf16 %v19_v49, %v19_v49  ;;  %v477_v52 = vld [vmem:[%s798_s2] ss:$0 sm:$0xff] }
  0x11   :  { %547 = vmatpush3.bf16.msra.mxu1 %v608_v15 }
  0x12   :  { %548 = vmatprep.subr.bf16.mxu1 %v611_v18 }
  0x13   :  { %527 = vmatpush3.bf16.msra.mxu0 %v610_v17 }
  0x14   :  { %528 = vmatprep.subr.bf16.mxu0 %v613_v20 }
  0x15   :  { %549 = vmatpush3.bf16.msra.mxu1 %v612_v19 }
  0x16   :  { %550 = vmatprep.subr.bf16.mxu1 %v615_v22 }
  0x17   :  { %529 = vmatpush3.bf16.msra.mxu0 %v614_v21 }
  0x18   :  { %530 = vmatprep.subr.bf16.mxu0 %v617_v24 }
  0x19   :  { %551 = vmatpush3.bf16.msra.mxu1 %v616_v23 }
  0x1a   :  { %552 = vmatprep.subr.bf16.mxu1 %v619_v26 }
  0x1b   :  { %531 = vmatpush3.bf16.msra.mxu0 %v618_v25 }
  0x1c   :  { %532 = vmatprep.subr.bf16.mxu0 %v621_v28 }
  0x1d   :  { %553 = vmatpush3.bf16.msra.mxu1 %v620_v27 }
  0x1e   :  { %554 = vmatprep.subr.bf16.mxu1 %v623_v30 }
  0x1f   :  { %533 = vmatpush3.bf16.msra.mxu0 %v622_v29 }
  0x20   :  { %571 = vmatprep.subr.bf16.mxu0 %v633_v35 }
  0x21   :  { %555 = vmatpush3.bf16.msra.mxu1 %v624_v33 }
  0x22   :  { %385 = vmatmul.mubr.bf16.vlgmr.msra.gmra.mrb[0].mxu0 %v20_v37 }
  0x23   :  { %572 = vmatpush3.bf16.msra.mxu0 %v625_v39  ;;  %587 = vmatprep.mubr.msk.bf16.mxu0 %vm634_vm0, %v633_v35 }
  0x24   :  { %425 = vmatmul.mubr.bf16.vlgmr.msra.gmra.mrb[0].mxu1 %v22_v41  ;;  %573 = vmatprep.subr.bf16.mxu0 %v633_v35 }
  0x27   :  { %574 = vmatpush3.bf16.msra.mxu0 %v626_v42 }
  0x28   :  { %575 = vmatprep.subr.bf16.mxu0 %v633_v35 }
  0x2b   :  { %576 = vmatpush3.bf16.msra.mxu0 %v627_v43 }
  0x2c   :  { %577 = vmatprep.subr.bf16.mxu0 %v633_v35 }
  0x2f   :  { %578 = vmatpush3.bf16.msra.mxu0 %v628_v44 }
  0x30   :  { %579 = vmatprep.subr.bf16.mxu0 %v633_v35 }
  0x33   :  { %580 = vmatpush3.bf16.msra.mxu0 %v629_v45 }
  0x34   :  { %581 = vmatprep.subr.bf16.mxu0 %v633_v35 }
  0x37   :  { %582 = vmatpush3.bf16.msra.mxu0 %v630_v46 }
  0x38   :  { %583 = vmatprep.subr.bf16.mxu0 %v633_v35 }
  0x3b   :  { %584 = vmatpush3.bf16.msra.mxu0 %v631_v47 }
  0x3c   :  { %585 = vmatprep.subr.bf16.mxu0 %v633_v35 }
  0x3f   :  { %586 = vmatpush3.bf16.msra.mxu0 %v632_v48 }
  0x42   :  { %588 = vmatmul.mubr.bf16.vlgmr.msra.gmra.mrb[4].mxu0 %v24_v50 }
  0xf5   :  { %v534_v51 = vpop.f32.mrb[0].mxu0 }
  0xf6   :  { %v535_v53 = vpop.f32.mrb[1].mxu0 }
  0xf7   :  { %v536_v54 = vadd.f32 %v535_v53, %v534_v51  ;;  %v537_v55 = vpop.f32.mrb[2].mxu0  ;;  %v556_v56 = vpop.f32.mrb[0].mxu1 }
  0xf8   :  { %v538_v57 = vpop.f32.mrb[3].mxu0  ;;  %v557_v58 = vpop.f32.mrb[1].mxu1 }
  0xf9   :  { %v387_v59 = vadd.f32 %v536_v54, %v477_v52  ;;  %v558_v60 = vadd.f32 %v557_v58, %v556_v56  ;;  %v559_v61 = vpop.f32.mrb[2].mxu1 }
  0xfa   :  { %v560_v62 = vpop.f32.mrb[3].mxu1 }
  0xfb   :  { %v427_v63 = vadd.f32 %v558_v60, %v387_v59 }
 0x115   :  { %v466_v0 = vpop.f32.mrb[4].mxu0 }
 0x116   :  { %v467_v1 = vadd.f32 %v466_v0, %v427_v63  ;;  %v589_v2 = vpop.f32.mrb[5].mxu0 }
 0x117   :  { %v469_v3 = vpop.f32.mrb[6].mxu0 }
 0x118   :  { %472 = vst [vmem:[%s799_s3] sm:$0xff] %v467_v1  ;;  %v590_v4 = vpop.f32.mrb[7].mxu0 }

// kernel: _forward_impl.7
= control target key start
LH: loop header
LB: loop body
LE: loop exit
PB: predicated region body
PF: predicated region fallthrough
CT: control target
= control target key end

     0   :  { %s380_s9 = smov 0   ;;  %s454_s0 = inlined_call_operand.vmem [shape: f32[2,8,128], index: 0, kind: input, shape index: {}]   ;;  %s455_s1 = inlined_call_operand.vmem [shape: f32[2,128], index: 1, kind: input, shape index: {}]   ;;  %s456_s2 = inlined_call_operand.vmem [shape: f32[2,128,4], index: 2, kind: output, shape index: {}]  }
   0x1 LB: > { %s333_s10 = sadd.s32 4294967295, %s362_s9   ;;  %p337_p0 = scmp.ge.s32.totalorder %s362_s9, 1  ;;  %s362_s9 = sphi %s380_s9, %s12_s9  }
   0x2   : > { %p111_p1 = scmp.lt.s32.totalorder %s362_s9, 3 }
   0x4   : > { %p112_p2 = pnand %p337_p0, %p111_p1 }
   0x5   : > { %p132_p3 = scmp.lt.s32.totalorder (!%p112_p2), %s333_s10, 1  ;;  %v155_v7 = vlaneseq (!%p112_p2)  ;;  %v142_v11 = vld [vmem:[%s455_s1] sm:$0x3] (!%p112_p2)  ;;  %s364_s17 = smov (!%p112_p2), 127   ;;  %vm261_vm0 = vcmask (!%p112_p2), 31744  }
   0x6   : > { %115 = sbr.rel (%p112_p2) target bundleno = 633 (0x279), region = 28 }
   0x7   : > { %v156_v9 = vshrl.u32 (!%p112_p2), %v155_v7, 7 }
   0x9   : > { %v157_v10 = vsub.s32 (!%p112_p2), 0, %v156_v9  ;;  %v162_v12 = vsub.s32 (!%p112_p2), 1, %v156_v9 }
   0xb   : > { %v158_v13 = vrot.slane (!%p112_p2), %v142_v11, %v157_v10  ;;  %v163_v16 = vrot.slane (!%p112_p2), %v142_v11, %v162_v12 }
   0xd   : > { %s458_s10 = smov (!%p132_p3, %s333_s10), 1 }
   0xe   : > { %s338_s11 = sshll.u32 %s458_s10, 3  ;;  %s343_s18 = sshll.u32 %s458_s10, 7 }
   0xf   : > { %s135_s14 = scalar_lea.vmem %s454_s0, %s338_s11  ;;  %s417_s21 = scalar_lea.vmem %s456_s2, %s343_s18 }
  0x10   : > { %v141_v0 = vld [vmem:[%s135_s14] sm:$0xff] }
  0x11   : > { %143 = vadd.xlane.f32.xlu0 %v141_v0 }
  0x9e   : > { %v144_v1 = vpop.xlane.xlu0 %143 }
  0x9f   : > { %v146_v2 = vmul.f32 0.0078125, %v144_v1 }
  0xa1   : > { %v147_v3 = vsub.f32 %v141_v0, %v146_v2 }
  0xa3   : > { %v148_v4 = vmul.f32 %v147_v3, %v147_v3 }
  0xa5   : > { %149 = vadd.xlane.f32.xlu0 %v148_v4 }
 0x132   : > { %v150_v5 = vpop.xlane.xlu0 %149 }
 0x133   : > { %v151_v6 = vmul.f32 0.0078125, %v150_v5 }
 0x135   : > { %v152_v8 = vadd.f32 1e-06, %v151_v6 }
 0x137   : > { %354 = vrsqrt.f32 %v152_v8 }
 0x141   : > { %v355_v14 = vpop.eup %354 }
 0x142   : > { %v154_v15 = vmul.f32 %v355_v14, %v147_v3 }
 0x144   : > { %v159_v17 = vmul.f32 %v158_v13, %v154_v15 }
 0x146   : > { %v164_v18 = vadd.f32 %v163_v16, %v159_v17 }
 0x148   : > { %165 = vxpose.xlu1.b32.start.end [1/1] (short) %v164_v18, 128 }
 0x1c8   : > { %v181_v19 = vpop.trf.xlu1 }
 0x1c9   : > { %213 = vrot.lane.b32.xlu1 %v181_v19, %s364_s17 }
 0x1cc   : > { %v182_v20 = vpop.trf.xlu1 }
 0x1cd   : > { %215 = vrot.lane.b32.xlu0 %v182_v20, %s364_s17 }
 0x1d0   : > { %v183_v21 = vpop.trf.xlu1 }
 0x1d1   : > { %217 = vrot.lane.b32.xlu0 %v183_v21, %s364_s17 }
 0x1d4   : > { %v184_v22 = vpop.trf.xlu1 }
 0x1d5   : > { %219 = vrot.lane.b32.xlu0 %v184_v22, %s364_s17 }
 0x1d8   : > { %v185_v23 = vpop.trf.xlu1 }
 0x1d9   : > { %221 = vrot.lane.b32.xlu0 %v185_v23, %s364_s17 }
 0x1dc   : > { %v186_v24 = vpop.trf.xlu1 }
 0x1dd   : > { %223 = vrot.lane.b32.xlu0 %v186_v24, %s364_s17 }
 0x1e0   : > { %v187_v25 = vpop.trf.xlu1 }
 0x1e1   : > { %225 = vrot.lane.b32.xlu0 %v187_v25, %s364_s17 }
 0x1e4   : > { %v188_v26 = vpop.trf.xlu1 }
 0x1e5   : > { %227 = vrot.lane.b32.xlu0 %v188_v26, %s364_s17 }
 0x1e8   : > { %v189_v27 = vpop.trf.xlu1 }
 0x1e9   : > { %229 = vrot.lane.b32.xlu0 %v189_v27, %s364_s17 }
 0x1ec   : > { %v190_v28 = vpop.trf.xlu1 }
 0x1ed   : > { %231 = vrot.lane.b32.xlu0 %v190_v28, %s364_s17 }
 0x1f0   : > { %v191_v29 = vpop.trf.xlu1 }
 0x1f1   : > { %233 = vrot.lane.b32.xlu0 %v191_v29, %s364_s17 }
 0x1f4   : > { %v192_v30 = vpop.trf.xlu1 }
 0x1f5   : > { %235 = vrot.lane.b32.xlu0 %v192_v30, %s364_s17 }
 0x1f8   : > { %v193_v31 = vpop.trf.xlu1 }
 0x1f9   : > { %237 = vrot.lane.b32.xlu0 %v193_v31, %s364_s17 }
 0x1fc   : > { %v194_v32 = vpop.trf.xlu1 }
 0x1fd   : > { %239 = vrot.lane.b32.xlu0 %v194_v32, %s364_s17 }
 0x200   : > { %v195_v33 = vpop.trf.xlu1 }
 0x201   : > { %241 = vrot.lane.b32.xlu0 %v195_v33, %s364_s17 }
 0x204   : > { %v196_v34 = vpop.trf.xlu1 }
 0x205   : > { %243 = vrot.lane.b32.xlu0 %v196_v34, %s364_s17 }
 0x23b   : > { %v214_v35 = vpop.permute.xlu1 %213 }
 0x23c   : > { %262 = vst.msk [vmem:[%s417_s21] sm:$0xff] %vm261_vm0, %v214_v35 }
 0x23f   : > { %v216_v36 = vpop.permute.xlu0 %215 }
 0x240   : > { %263 = vst.msk [vmem:[%s417_s21 + $0x8] sm:$0xff] %vm261_vm0, %v216_v36 }
 0x243   : > { %v218_v37 = vpop.permute.xlu0 %217 }
 0x244   : > { %264 = vst.msk [vmem:[%s417_s21 + $0x10] sm:$0xff] %vm261_vm0, %v218_v37 }
 0x247   : > { %v220_v38 = vpop.permute.xlu0 %219 }
 0x248   : > { %265 = vst.msk [vmem:[%s417_s21 + $0x18] sm:$0xff] %vm261_vm0, %v220_v38 }
 0x24b   : > { %v222_v39 = vpop.permute.xlu0 %221 }
 0x24c   : > { %266 = vst.msk [vmem:[%s417_s21 + $0x20] sm:$0xff] %vm261_vm0, %v222_v39 }
 0x24f   : > { %v224_v40 = vpop.permute.xlu0 %223 }
 0x250   : > { %267 = vst.msk [vmem:[%s417_s21 + $0x28] sm:$0xff] %vm261_vm0, %v224_v40 }
 0x253   : > { %v226_v41 = vpop.permute.xlu0 %225 }
 0x254   : > { %268 = vst.msk [vmem:[%s417_s21 + $0x30] sm:$0xff] %vm261_vm0, %v226_v41 }
 0x257   : > { %v228_v42 = vpop.permute.xlu0 %227 }
 0x258   : > { %269 = vst.msk [vmem:[%s417_s21 + $0x38] sm:$0xff] %vm261_vm0, %v228_v42 }
 0x25b   : > { %v230_v43 = vpop.permute.xlu0 %229 }
 0x25c   : > { %270 = vst.msk [vmem:[%s417_s21 + $0x40] sm:$0xff] %vm261_vm0, %v230_v43 }
 0x25f   : > { %v232_v44 = vpop.permute.xlu0 %231 }
 0x260   : > { %271 = vst.msk [vmem:[%s417_s21 + $0x48] sm:$0xff] %vm261_vm0, %v232_v44 }
 0x263   : > { %v234_v45 = vpop.permute.xlu0 %233 }
 0x264   : > { %272 = vst.msk [vmem:[%s417_s21 + $0x50] sm:$0xff] %vm261_vm0, %v234_v45 }
 0x267   : > { %v236_v46 = vpop.permute.xlu0 %235 }
 0x268   : > { %273 = vst.msk [vmem:[%s417_s21 + $0x58] sm:$0xff] %vm261_vm0, %v236_v46 }
 0x26b   : > { %v238_v47 = vpop.permute.xlu0 %237 }
 0x26c   : > { %274 = vst.msk [vmem:[%s417_s21 + $0x60] sm:$0xff] %vm261_vm0, %v238_v47 }
 0x26f   : > { %v240_v48 = vpop.permute.xlu0 %239 }
 0x270   : > { %275 = vst.msk [vmem:[%s417_s21 + $0x68] sm:$0xff] %vm261_vm0, %v240_v48 }
 0x273   : > { %v242_v49 = vpop.permute.xlu0 %241 }
 0x274   : > { %276 = vst.msk [vmem:[%s417_s21 + $0x70] sm:$0xff] %vm261_vm0, %v242_v49 }
 0x277   : > { %v244_v50 = vpop.permute.xlu0 %243 }
 0x278   : > { %277 = vst.msk [vmem:[%s417_s21 + $0x78] sm:$0xff] %vm261_vm0, %v244_v50 }
 0x279 PF: > { %s12_s9 = sadd.s32 1, %s362_s9  }
 0x27a   : > { %p9_p4 = scmp.ge.s32.totalorder %s12_s9, 4  }
 0x27c   :  { %11 = sbr.rel (!%p9_p4) target bundleno = 1 (0x1), region = 58 }

// kernel: _forward_impl.5
= control target key start
LH: loop header
LB: loop body
LE: loop exit
PB: predicated region body
PF: predicated region fallthrough
CT: control target
= control target key end

     0   :  { %s1844_s17 = smov 0   ;;  %s2151_s0 = inlined_call_operand.vmem [shape: f32[2,8,128], index: 0, kind: input, shape index: {}]   ;;  %s2152_s1 = inlined_call_operand.vmem [shape: f32[2,128], index: 1, kind: input, shape index: {}, may-alias: {1,6}]   ;;  %s2153_s2 = inlined_call_operand.vmem [shape: bf16[128,384], index: 2, kind: input, shape index: {}]   ;;  %s2154_s3 = inlined_call_operand.vmem [shape: f32[1,384], index: 3, kind: input, shape index: {}]   ;;  %s2155_s4 = inlined_call_operand.vmem [shape: bf16[128,128], index: 4, kind: input, shape index: {}]   ;;  %s2156_s5 = inlined_call_operand.vmem [shape: f32[1,128], index: 5, kind: input, shape index: {}, may-alias: {5,10}]   ;;  %s2157_s6 = inlined_call_operand.vmem [shape: f32[2,128], index: 6, kind: input, shape index: {}, may-alias: {1,6}]   ;;  %s2158_s7 = inlined_call_operand.vmem [shape: bf16[128,256], index: 7, kind: input, shape index: {}]   ;;  %s2159_s8 = inlined_call_operand.vmem [shape: f32[1,256], index: 8, kind: input, shape index: {}]   ;;  %s2160_s9 = inlined_call_operand.vmem [shape: bf16[256,128], index: 9, kind: input, shape index: {}]   ;;  %s2161_s10 = inlined_call_operand.vmem [shape: f32[1,128], index: 10, kind: input, shape index: {}, may-alias: {5,10}]   ;;  %s2162_s11 = inlined_call_operand.vmem [shape: f32[2,8,128], index: 11, kind: output, shape index: {}]  }
   0x1 LB: > { %s1467_s18 = sadd.s32 4294967295, %s1777_s17   ;;  %p1471_p0 = scmp.ge.s32.totalorder %s1777_s17, 1  ;;  %s1777_s17 = sphi %s1844_s17, %s21_s17  }
   0x2   : > { %p336_p1 = scmp.lt.s32.totalorder %s1777_s17, 3 }
   0x4   : > { %p337_p2 = pnand %p1471_p0, %p336_p1 }
   0x5   : > { %p374_p3 = scmp.lt.s32.totalorder (!%p337_p2), %s1467_s18, 1  ;;  %v1671_v1 = vld [vmem:[%s2153_s2 + $0x4] ss:$12 sps:$4 sm:$0xff] (!%p337_p2)   ;;  %v1673_v2 = vld [vmem:[%s2153_s2] ss:$12 sps:$4 sm:$0xff] (!%p337_p2)   ;;  %v1779_v3 = vmov (!%p337_p2), 0.0   ;;  %v384_v33 = vlaneseq (!%p337_p2) }
   0x6   : > { %340 = sbr.rel (%p337_p2) target bundleno = 2658 (0xa62), region = 64  ;;  %1594 = vmatprep.subr.bf16.mxu1 (!%p337_p2), %v1779_v3  ;;  %v1674_v4 = vld [vmem:[%s2153_s2 + $0x8] ss:$12 sps:$4 sm:$0xff] (!%p337_p2)   ;;  %v1677_v6 = vld [vmem:[%s2153_s2 + $0x18] ss:$12 sps:$4 sm:$0xff] (!%p337_p2)   ;;  %589 = vmatprep.subr.bf16.mxu0 (!%p337_p2), %v1671_v1  ;;  %v1780_v25 = vmov (!%p337_p2), 0  }
   0x7   : > { %v1675_v5 = vld [vmem:[%s2153_s2 + $0x1c] ss:$12 sps:$4 sm:$0xff] (!%p337_p2)   ;;  %v1678_v7 = vld [vmem:[%s2153_s2 + $0x20] ss:$12 sps:$4 sm:$0xff] (!%p337_p2)   ;;  %590 = vmatpush1.bf16.msra.mxu0 (!%p337_p2), %v1673_v2  ;;  %1595 = vmatpush3.bf16.msra.mxu1 (!%p337_p2), %v1674_v4  ;;  %v1682_v14 = vld [vmem:[%s2153_s2 + $0x38] ss:$12 sps:$4 sm:$0xff] (!%p337_p2)  }
   0x8   : > { %v1679_v8 = vld [vmem:[%s2153_s2 + $0x34] ss:$12 sps:$4 sm:$0xff] (!%p337_p2)   ;;  %591 = vmatprep.subr.bf16.mxu0 (!%p337_p2), %v1675_v5  ;;  %1596 = vmatprep.subr.bf16.mxu1 (!%p337_p2), %v1779_v3  ;;  %v1681_v13 = vld [vmem:[%s2153_s2 + $0x30] ss:$12 sps:$4 sm:$0xff] (!%p337_p2)   ;;  %v1683_v15 = vld [vmem:[%s2153_s2 + $0x4c] ss:$12 sps:$4 sm:$0xff] (!%p337_p2)  }
   0x9   : > { %v1685_v16 = vld [vmem:[%s2153_s2 + $0x48] ss:$12 sps:$4 sm:$0xff] (!%p337_p2)   ;;  %v1686_v17 = vld [vmem:[%s2153_s2 + $0x50] ss:$12 sps:$4 sm:$0xff] (!%p337_p2)   ;;  %v1689_v19 = vld [vmem:[%s2153_s2 + $0x60] ss:$12 sps:$4 sm:$0xff] (!%p337_p2)   ;;  %621 = vmatprep.mubr.bf16.mxu0 (!%p337_p2), %v1780_v25 }
   0xa   : > { %v1687_v18 = vld [vmem:[%s2153_s2 + $0x64] ss:$12 sps:$4 sm:$0xff] (!%p337_p2)   ;;  %v1690_v20 = vld [vmem:[%s2153_s2 + $0x68] ss:$12 sps:$4 sm:$0xff] (!%p337_p2)   ;;  %v1694_v23 = vld [vmem:[%s2153_s2 + $0x80] ss:$12 sps:$4 sm:$0xff] (!%p337_p2)  }
   0xb   : > { %592 = vmatpush1.bf16.msra.mxu0 (!%p337_p2), %v1677_v6  ;;  %1597 = vmatpush3.bf16.msra.mxu1 (!%p337_p2), %v1678_v7  ;;  %v1691_v21 = vld [vmem:[%s2153_s2 + $0x7c] ss:$12 sps:$4 sm:$0xff] (!%p337_p2)   ;;  %v1693_v22 = vld [vmem:[%s2153_s2 + $0x78] ss:$12 sps:$4 sm:$0xff] (!%p337_p2)   ;;  %v1695_v24 = vld [vmem:[%s2153_s2 + $0x94] ss:$12 sps:$4 sm:$0xff] (!%p337_p2)  }
   0xc   : > { %593 = vmatprep.subr.bf16.mxu0 (!%p337_p2), %v1679_v8  ;;  %1598 = vmatprep.subr.bf16.mxu1 (!%p337_p2), %v1779_v3  ;;  %vm1781_vm0 = vmmov (!%p337_p2), 0   ;;  %v1697_v26 = vld [vmem:[%s2153_s2 + $0x90] ss:$12 sps:$4 sm:$0xff] (!%p337_p2)   ;;  %v1698_v27 = vld [vmem:[%s2153_s2 + $0x98] ss:$12 sps:$4 sm:$0xff] (!%p337_p2)   ;;  %v402_v35 = vshrl.u32 (!%p337_p2), %v384_v33, 7 }
   0xd   : > { %s2164_s18 = smov (!%p374_p3, %s1467_s18), 1  ;;  %1610 = vmatprep.mubr.msk.bf16.mxu1 %vm1781_vm0, %v1779_v3  ;;  %v1699_v28 = vld [vmem:[%s2153_s2 + $0xac] ss:$12 sps:$4 sm:$0xff]   ;;  %v1701_v29 = vld [vmem:[%s2153_s2 + $0xa8] ss:$12 sps:$4 sm:$0xff]   ;;  %vm673_vm1 = vcmask 523264  }
   0xe   : > { %s1472_s19 = sshll.u32 %s2164_s18, 3  ;;  %v1702_v30 = vld [vmem:[%s2153_s2 + $0xb0] ss:$12 sps:$4 sm:$0xff]   ;;  %v1949_v36 = vsub.s32 0, %v402_v35  ;;  %v388_v37 = vld [vmem:[%s2152_s1] sm:$0x3] }
   0xf   : > { %s377_s22 = scalar_lea.vmem %s2151_s0, %s1472_s19  ;;  %594 = vmatpush1.bf16.msra.mxu0 %v1681_v13  ;;  %1599 = vmatpush3.bf16.msra.mxu1 %v1682_v14  ;;  %v1954_v38 = vsub.s32 1, %v402_v35  ;;  %v444_v46 = vld [vmem:[%s2154_s3] sm:$0x7]  ;;  %v456_v47 = vsub.s32 2, %v402_v35  ;;  %s1782_s27 = smov 64   ;;  %vm734_vm2 = vcmask 1043456  }
  0x10   : > { %v1860_v0 = vld [vmem:[%s377_s22] sm:$0xff]  ;;  %1600 = vmatprep.subr.bf16.mxu1 %v1779_v3  ;;  %595 = vmatprep.subr.bf16.mxu0 %v1683_v15  ;;  %v404_v39 = vrot.slane %v388_v37, %v1949_v36  ;;  %v449_v48 = vrot.slane %v444_v46, %v1949_v36  ;;  %v385_v5 = vand.u32 127, %v384_v33  ;;  %v1783_v6 = vmov -1e+30   ;;  %s381_s22 = scalar_lea.vmem %s2162_s11, %s1472_s19 }
  0x11   : > { %389 = vadd.xlane.f32.xlu0 %v1860_v0  ;;  %v409_v42 = vrot.slane %v388_v37, %v1954_v38  ;;  %v453_v49 = vrot.slane %v444_v46, %v1954_v38  ;;  %v457_v50 = vrot.slane %v444_v46, %v456_v47  ;;  %vm720_vm4 = vcmask 64512   ;;  %v1705_v46 = vld [vmem:[%s2155_s4 + $0x10] sm:$0xff]   ;;  %v1707_v47 = vld [vmem:[%s2155_s4 + $0x20] sm:$0xff]  }
  0x12   : > { %vm386_vm3 = vcmp.lt.s32.totalorder %v385_v5, 5 }
  0x13   : > { %596 = vmatpush1.bf16.msra.mxu0 %v1685_v16  ;;  %1601 = vmatpush3.bf16.msra.mxu1 %v1686_v17  ;;  %v387_v7 = vsel %vm386_vm3, 0.0, %v1783_v6 }
  0x14   : > { %1602 = vmatprep.subr.bf16.mxu1 %v1779_v3  ;;  %597 = vmatprep.subr.bf16.mxu0 %v1687_v18 }
  0x17   : > { %598 = vmatpush1.bf16.msra.mxu0 %v1689_v19  ;;  %1603 = vmatpush3.bf16.msra.mxu1 %v1690_v20 }
  0x18   : > { %599 = vmatprep.subr.bf16.mxu0 %v1691_v21  ;;  %1604 = vmatprep.subr.bf16.mxu1 %v1779_v3 }
  0x1b   : > { %600 = vmatpush1.bf16.msra.mxu0 %v1693_v22  ;;  %1605 = vmatpush3.bf16.msra.mxu1 %v1694_v23 }
  0x1c   : > { %601 = vmatprep.subr.bf16.mxu0 %v1695_v24  ;;  %1606 = vmatprep.subr.bf16.mxu1 %v1779_v3 }
  0x1f   : > { %602 = vmatpush1.bf16.msra.mxu0 %v1697_v26  ;;  %1607 = vmatpush3.bf16.msra.mxu1 %v1698_v27 }
  0x20   : > { %603 = vmatprep.subr.bf16.mxu0 %v1699_v28  ;;  %1608 = vmatprep.subr.bf16.mxu1 %v1779_v3 }
  0x23   : > { %604 = vmatpush1.bf16.msra.mxu0 %v1701_v29  ;;  %1609 = vmatpush3.bf16.msra.mxu1 %v1702_v30 }
  0x24   : > { %1614 = vmatprep.subr.bf16.mxu1 %v1779_v3  ;;  %1638 = vmatprep.subr.bf16.mxu0 %v1779_v3 }
  0x9e   : > { %v390_v9 = vpop.xlane.xlu0 %389 }
  0x9f   : > { %v392_v10 = vmul.f32 0.0078125, %v390_v9 }
  0xa1   : > { %v393_v11 = vsub.f32 %v1860_v0, %v392_v10 }
  0xa3   : > { %v394_v12 = vmul.f32 %v393_v11, %v393_v11 }
  0xa5   : > { %395 = vadd.xlane.f32.xlu0 %v394_v12 }
 0x132   : > { %v396_v31 = vpop.xlane.xlu0 %395 }
 0x133   : > { %v397_v32 = vmul.f32 0.0078125, %v396_v31 }
 0x135   : > { %v398_v34 = vadd.f32 1e-06, %v397_v32 }
 0x137   : > { %1751 = vrsqrt.f32 %v398_v34 }
 0x141   : > { %v1752_v40 = vpop.eup %1751 }
 0x142   : > { %v400_v41 = vmul.f32 %v1752_v40, %v393_v11 }
 0x144   : > { %v405_v43 = vmul.f32 %v404_v39, %v400_v41 }
 0x146   : > { %v410_v44 = vadd.f32 %v409_v42, %v405_v43 }
 0x148   : > { %v411_v45 = vpack.c.bf16 %v410_v44, %v410_v44  ;;  %v1703_v44 = vld [vmem:[%s2155_s4] sm:$0xff]  }
 0x14a   : > { %622 = vmatmul.mubr.bf16.vlgmr.msra.gmra.mrb[0].mxu0 %v411_v45  ;;  %1611 = vmatmul.mubr.bf16.vlgmr.msra.gmra.mrb[0].mxu1 %v411_v45  ;;  %v1704_v45 = vld [vmem:[%s2155_s4 + $0x8] sm:$0xff]  }
 0x14b   : > { %1616 = vmatprep.mubr.msk.bf16.mxu1 %vm1781_vm0, %v1779_v3  ;;  %1654 = vmatprep.mubr.msk.bf16.mxu0 %vm1781_vm0, %v1779_v3 }
 0x14c   : > { %1639 = vmatpush3.bf16.msra.mxu0 %v1703_v44  ;;  %v1738_v44 = vld [vmem:[%s2160_s9 + $0x8] sm:$0xff]  }
 0x14d   : > { %1640 = vmatprep.subr.bf16.mxu0 %v1779_v3 }
 0x150   : > { %1641 = vmatpush3.bf16.msra.mxu0 %v1704_v45  ;;  %v1739_v45 = vld [vmem:[%s2160_s9 + $0x50] sm:$0xff]  }
 0x151   : > { %1642 = vmatprep.subr.bf16.mxu0 %v1779_v3 }
 0x154   : > { %1643 = vmatpush3.bf16.msra.mxu0 %v1705_v46  ;;  %v1740_v46 = vld [vmem:[%s2160_s9 + $0x10] sm:$0xff]  }
 0x155   : > { %1644 = vmatprep.subr.bf16.mxu0 %v1779_v3 }
 0x21d   : > { %v623_v51 = vpop.f32.mrb[0].mxu0  ;;  %v664_v52 = vpop.f32.mrb[0].mxu1 }
 0x21e   : > { %v624_v53 = vadd.f32 %v623_v51, %v449_v48  ;;  %v625_v54 = vpop.f32.mrb[1].mxu0  ;;  %v1612_v55 = vpop.f32.mrb[1].mxu1  ;;  %v665_v60 = vadd.f32 %v664_v52, %v457_v50  ;;  %v1708_v48 = vld [vmem:[%s2155_s4 + $0x28] sm:$0xff]   ;;  %v1710_v51 = vld [vmem:[%s2155_s4 + $0x38] sm:$0xff]  }
 0x21f   : > { %v626_v56 = vadd.f32 %v625_v54, %v453_v49  ;;  %v627_v57 = vpop.f32.mrb[2].mxu0  ;;  %v667_v58 = vpop.f32.mrb[2].mxu1  ;;  %v1709_v49 = vld [vmem:[%s2155_s4 + $0x30] sm:$0xff]  }
 0x220   : > { %v670_v59 = vpack.c.bf16 %v624_v53, %v624_v53  ;;  %v628_v61 = vpop.f32.mrb[3].mxu0  ;;  %v1613_v62 = vpop.f32.mrb[3].mxu1  ;;  %v672_v2 = vpack.c.bf16 %v665_v60, %v665_v60 }
 0x221   : > { %v671_v63 = vpack.c.bf16 %v626_v56, %v626_v56 }
 0x222   : > { %781 = vrot.lane.b32.xlu0 %v670_v59, %s1782_s27  ;;  %v736_v4 = vsel %vm734_vm2, %v672_v2, 0 }
 0x223   : > { %v678_v1 = vsel %vm673_vm1, %v671_v63, 0 }
 0x224   : > { %1615 = vmatpush3.bf16.xpose.msra.mxu1 %v678_v1 }
 0x225   : > { %1620 = vmatprep.subr.bf16.mxu1 %v1779_v3 }
 0x226   : > { %843 = vrot.lane.b32.xlu0 %v672_v2, %s1782_s27 }
 0x22b   : > { %1617 = vmatmul.mubr.msk.bf16.vlgmr.msra.gmra.mrb[4].mxu1 %vm673_vm1, %v670_v59 }
 0x22c   : > { %1621 = vmatpush3.bf16.msra.mxu1 %v736_v4  ;;  %1622 = vmatprep.mubr.msk.bf16.mxu1 %vm1781_vm0, %v1779_v3 }
 0x22d   : > { %1626 = vmatprep.subr.bf16.mxu1 %v1779_v3 }
 0x294   : > { %v782_v20 = vpop.permute.xlu0 %781 }
 0x298   : > { %v844_v22 = vpop.permute.xlu0 %843 }
 0x299   : > { %v849_v23 = vsel %vm734_vm2, %v844_v22, 0  ;;  %v1726_v22 = vld [vmem:[%s2158_s7 + $0x50] ss:$8 sps:$4 sm:$0xff]  }
 0x2fe   : > { %v714_v8 = vpop.f32.mrb[4].mxu1 }
 0x2ff   : > { %v715_v9 = vadd.f32 %v714_v8, %v387_v7  ;;  %v1618_v10 = vpop.f32.mrb[5].mxu1  ;;  %v1711_v8 = vld [vmem:[%s2158_s7] ss:$8 sps:$4 sm:$0xff]  }
 0x300   : > { %v717_v11 = vpop.f32.mrb[6].mxu1  ;;  %v1716_v10 = vld [vmem:[%s2158_s7 + $0x14] ss:$8 sps:$4 sm:$0xff]  }
 0x301   : > { %v1619_v12 = vpop.f32.mrb[7].mxu1  ;;  %v721_v13 = vsel %vm720_vm4, %v715_v9, -inf  ;;  %v1719_v11 = vld [vmem:[%s2158_s7 + $0x24] ss:$8 sps:$4 sm:$0xff]  }
 0x302   : > { %722 = vmax.xlane.f32.xlu1 %v721_v13  ;;  %v1717_v12 = vld [vmem:[%s2158_s7 + $0x20] ss:$8 sps:$4 sm:$0xff]  }
 0x313   : > { %784 = vrot.lane.b32.xlu1 %v671_v63, %s1782_s27  ;;  %v1502_v63 = vld [vmem:[%s2156_s5] ss:$0 sm:$0xff] }
 0x38f   : > { %v723_v14 = vpop.xlane.xlu1 %722 }
 0x390   : > { %v724_v15 = vsub.f32 %v715_v9, %v723_v14  ;;  %v1713_v9 = vld [vmem:[%s2158_s7 + $0x4] ss:$8 sps:$4 sm:$0xff]  }
 0x392   : > { %v725_v16 = vmul.f32 1.442695, %v724_v15 }
 0x393   : > { %v785_v18 = vpop.permute.xlu1 %784 }
 0x394   : > { %1753 = vpow2.f32 %v725_v16  ;;  %v790_v21 = vsel %vm673_vm1, %v785_v18, 0  ;;  %v1720_v18 = vld [vmem:[%s2158_s7 + $0x30] ss:$8 sps:$4 sm:$0xff]  }
 0x39e   : > { %v1754_v17 = vpop.eup %1753 }
 0x39f   : > { %v730_v19 = vpack.c.bf16 %v1754_v17, %v1754_v17  ;;  %v727_v35 = vsel %vm720_vm4, %v1754_v17, 0.0  ;;  %v1722_v17 = vld [vmem:[%s2158_s7 + $0x34] ss:$8 sps:$4 sm:$0xff]  }
 0x3a1   : > { %1623 = vmatmul.mubr.msk.bf16.vlgmr.msra.gmra.mrb[8].mxu1 %vm720_vm4, %v730_v19  ;;  %v1725_v19 = vld [vmem:[%s2158_s7 + $0x44] ss:$8 sps:$4 sm:$0xff]  }
 0x3a2   : > { %1627 = vmatpush3.bf16.xpose.msra.mxu1 %v790_v21  ;;  %1628 = vmatprep.mubr.msk.bf16.mxu1 %vm1781_vm0, %v1779_v3  ;;  %v1728_v21 = vld [vmem:[%s2158_s7 + $0x54] ss:$8 sps:$4 sm:$0xff]  }
 0x3a3   : > { %1632 = vmatprep.subr.bf16.mxu1 %v1779_v3 }
 0x3a9   : > { %1629 = vmatmul.mubr.msk.bf16.vlgmr.msra.gmra.mrb[12].mxu1 %vm673_vm1, %v782_v20  ;;  %v1723_v20 = vld [vmem:[%s2158_s7 + $0x40] ss:$8 sps:$4 sm:$0xff]  }
 0x3aa   : > { %1633 = vmatpush3.bf16.msra.mxu1 %v849_v23  ;;  %1634 = vmatprep.mubr.msk.bf16.mxu1 %vm1781_vm0, %v1779_v3  ;;  %v1731_v23 = vld [vmem:[%s2158_s7 + $0x64] ss:$8 sps:$4 sm:$0xff]  }
 0x3ab   : > { %1142 = vmatprep.subr.bf16.mxu1 %v1713_v9 }
 0x474   : > { %v772_v24 = vpop.f32.mrb[8].mxu1 }
 0x475   : > { %v1624_v26 = vpop.f32.mrb[9].mxu1 }
 0x476   : > { %v775_v27 = vpop.f32.mrb[10].mxu1  ;;  %v1734_v26 = vld [vmem:[%s2158_s7 + $0x74] ss:$8 sps:$4 sm:$0xff]  }
 0x477   : > { %v1625_v28 = vpop.f32.mrb[11].mxu1  ;;  %v1732_v27 = vld [vmem:[%s2158_s7 + $0x70] ss:$8 sps:$4 sm:$0xff]  }
 0x47c   : > { %v826_v29 = vpop.f32.mrb[12].mxu1 }
 0x47d   : > { %v827_v30 = vadd.f32 %v826_v29, %v387_v7  ;;  %v1630_v31 = vpop.f32.mrb[13].mxu1 }
 0x47e   : > { %v829_v32 = vpop.f32.mrb[14].mxu1  ;;  %v1011_v31 = vld [vmem:[%s2157_s6] sm:$0x3] }
 0x47f   : > { %v1631_v33 = vpop.f32.mrb[15].mxu1  ;;  %v832_v34 = vsel %vm720_vm4, %v827_v30, -inf  ;;  %v1026_v32 = vrot.slane %v1011_v31, %v1949_v36 }
 0x480   : > { %833 = vmax.xlane.f32.xlu1 %v832_v34 }
 0x484   : > { %728 = vadd.xlane.f32.xlu1 %v727_v35  ;;  %v1031_v35 = vrot.slane %v1011_v31, %v1954_v38 }
 0x50d   : > { %v834_v37 = vpop.xlane.xlu1 %833 }
 0x50e   : > { %v835_v39 = vsub.f32 %v827_v30, %v834_v37 }
 0x510   : > { %v836_v40 = vmul.f32 1.442695, %v835_v39 }
 0x511   : > { %v729_v58 = vpop.xlane.xlu1 %728 }
 0x512   : > { %1755 = vpow2.f32 %v836_v40 }
 0x51c   : > { %v1756_v41 = vpop.eup %1755 }
 0x51d   : > { %v838_v42 = vsel %vm720_vm4, %v1756_v41, 0.0  ;;  %v841_v43 = vpack.c.bf16 %v1756_v41, %v1756_v41  ;;  %v1735_v41 = vld [vmem:[%s2160_s9 + $0x40] sm:$0xff]  }
 0x51e   : > { %839 = vadd.xlane.f32.xlu0 %v838_v42  ;;  %v1736_v42 = vld [vmem:[%s2160_s9] sm:$0xff]  }
 0x51f   : > { %1635 = vmatmul.mubr.msk.bf16.vlgmr.msra.gmra.mrb[16].mxu1 %vm720_vm4, %v841_v43  ;;  %v1737_v43 = vld [vmem:[%s2160_s9 + $0x48] sm:$0xff]  }
 0x520   : > { %1174 = vmatprep.mubr.bf16.mxu1 %v1780_v25  ;;  %v1706_v25 = vld [vmem:[%s2155_s4 + $0x18] sm:$0xff]   ;;  %1143 = vmatpush1.bf16.msra.mxu1 %v1711_v8 }
 0x521   : > { %1645 = vmatpush3.bf16.msra.mxu0 %v1706_v25  ;;  %1144 = vmatprep.subr.bf16.mxu1 %v1716_v10  ;;  %v1741_v25 = vld [vmem:[%s2160_s9 + $0x58] sm:$0xff]  }
 0x522   : > { %1646 = vmatprep.subr.bf16.mxu0 %v1779_v3 }
 0x525   : > { %1647 = vmatpush3.bf16.msra.mxu0 %v1707_v47  ;;  %v1742_v47 = vld [vmem:[%s2160_s9 + $0x18] sm:$0xff]  }
 0x526   : > { %1648 = vmatprep.subr.bf16.mxu0 %v1779_v3 }
 0x529   : > { %1649 = vmatpush3.bf16.msra.mxu0 %v1708_v48  ;;  %v1743_v48 = vld [vmem:[%s2160_s9 + $0x60] sm:$0xff]  }
 0x52a   : > { %1650 = vmatprep.subr.bf16.mxu0 %v1779_v3 }
 0x52d   : > { %1651 = vmatpush3.bf16.msra.mxu0 %v1709_v49  ;;  %v1744_v49 = vld [vmem:[%s2160_s9 + $0x20] sm:$0xff]  }
 0x52e   : > { %1652 = vmatprep.subr.bf16.mxu0 %v1779_v3 }
 0x531   : > { %1653 = vmatpush3.bf16.msra.mxu0 %v1710_v51  ;;  %v1746_v51 = vld [vmem:[%s2160_s9 + $0x28] sm:$0xff]  }
 0x532   : > { %1572 = vmatprep.subr.bf16.mxu0 %v1735_v41 }
 0x5ab   : > { %v840_v50 = vpop.xlane.xlu0 %839 }
 0x5ac   : > { %1757 = vrcp.f32 %v840_v50  ;;  %v1745_v50 = vld [vmem:[%s2160_s9 + $0x68] sm:$0xff]  }
 0x5ad   : > { %1759 = vrcp.f32 %v729_v58 }
 0x5b6   : > { %v1758_v52 = vpop.eup %1757 }
 0x5b7   : > { %v1760_v59 = vpop.eup %1759 }
 0x5b8   : > { %v779_v60 = vmul.f32 %v1760_v59, %v772_v24  ;;  %v1729_v24 = vld [vmem:[%s2158_s7 + $0x60] ss:$8 sps:$4 sm:$0xff]  }
 0x5f2   : > { %v885_v53 = vpop.f32.mrb[16].mxu1 }
 0x5f3   : > { %v892_v54 = vmul.f32 %v1758_v52, %v885_v53  ;;  %v1636_v55 = vpop.f32.mrb[17].mxu1  ;;  %v1747_v52 = vld [vmem:[%s2160_s9 + $0x70] sm:$0xff]  }
 0x5f4   : > { %v888_v56 = vpop.f32.mrb[18].mxu1  ;;  %v1748_v53 = vld [vmem:[%s2160_s9 + $0x30] sm:$0xff]   ;;  %v1750_v55 = vld [vmem:[%s2160_s9 + $0x38] sm:$0xff]  }
 0x5f5   : > { %894 = vrot.lane.b32.xlu1 %v892_v54, %s1782_s27  ;;  %v1637_v57 = vpop.f32.mrb[19].mxu1  ;;  %v1749_v54 = vld [vmem:[%s2160_s9 + $0x78] sm:$0xff]   ;;  %v1050_v56 = vld [vmem:[%s2159_s8] sm:$0x3] }
 0x5f6   : > { %v1055_v57 = vrot.slane %v1050_v56, %v1949_v36  ;;  %v1059_v58 = vrot.slane %v1050_v56, %v1954_v38 }
 0x667   : > { %v895_v3 = vpop.permute.xlu1 %894 }
 0x668   : > { %v897_v61 = vsel %vm673_vm1, %v779_v60, %v895_v3 }
 0x669   : > { %v898_v62 = vpack.c.bf16 %v897_v61, %v897_v61 }
 0x66b   : > { %1655 = vmatmul.mubr.bf16.vlgmr.msra.gmra.mrb[4].mxu0 %v898_v62 }
 0x66c   : > { %1573 = vmatpush3.bf16.msra.mxu0 %v1736_v42 }
 0x66d   : > { %1574 = vmatprep.subr.bf16.mxu0 %v1737_v43 }
 0x670   : > { %1575 = vmatpush3.bf16.msra.mxu0 %v1738_v44 }
 0x671   : > { %1576 = vmatprep.subr.bf16.mxu0 %v1739_v45 }
 0x674   : > { %1577 = vmatpush3.bf16.msra.mxu0 %v1740_v46 }
 0x675   : > { %1578 = vmatprep.subr.bf16.mxu0 %v1741_v25 }
 0x678   : > { %1579 = vmatpush3.bf16.msra.mxu0 %v1742_v47 }
 0x679   : > { %1580 = vmatprep.subr.bf16.mxu0 %v1743_v48 }
 0x67c   : > { %1581 = vmatpush3.bf16.msra.mxu0 %v1744_v49 }
 0x67d   : > { %1582 = vmatprep.subr.bf16.mxu0 %v1745_v50 }
 0x680   : > { %1583 = vmatpush3.bf16.msra.mxu0 %v1746_v51 }
 0x681   : > { %1584 = vmatprep.subr.bf16.mxu0 %v1747_v52 }
 0x684   : > { %1585 = vmatpush3.bf16.msra.mxu0 %v1748_v53 }
 0x685   : > { %1586 = vmatprep.subr.bf16.mxu0 %v1749_v54 }
 0x688   : > { %1587 = vmatpush3.bf16.msra.mxu0 %v1750_v55  ;;  %v1527_v55 = vld [vmem:[%s2161_s10] ss:$0 sm:$0xff] }
 0x73e   : > { %v1004_v1 = vpop.f32.mrb[4].mxu0 }
 0x73f   : > { %v1005_v2 = vadd.f32 %v1502_v63, %v1004_v1  ;;  %v1656_v4 = vpop.f32.mrb[5].mxu0 }
 0x740   : > { %v1007_v5 = vpop.f32.mrb[6].mxu0 }
 0x741   : > { %v2029_v6 = vadd.f32 %v1005_v2, %v1860_v0  ;;  %v1657_v7 = vpop.f32.mrb[7].mxu0  ;;  %v1714_v0 = vld [vmem:[%s2158_s7 + $0x10] ss:$8 sps:$4 sm:$0xff]  }
 0x742   : > { %1145 = vmatpush1.bf16.msra.mxu1 %v1714_v0 }
 0x743   : > { %1012 = vadd.xlane.f32.xlu0 %v2029_v6  ;;  %1146 = vmatprep.subr.bf16.mxu1 %v1719_v11 }
 0x746   : > { %1147 = vmatpush1.bf16.msra.mxu1 %v1717_v12 }
 0x747   : > { %1148 = vmatprep.subr.bf16.mxu1 %v1722_v17 }
 0x74a   : > { %1149 = vmatpush1.bf16.msra.mxu1 %v1720_v18 }
 0x74b   : > { %1150 = vmatprep.subr.bf16.mxu1 %v1725_v19 }
 0x74e   : > { %1151 = vmatpush1.bf16.msra.mxu1 %v1723_v20 }
 0x74f   : > { %1152 = vmatprep.subr.bf16.mxu1 %v1728_v21 }
 0x752   : > { %1153 = vmatpush1.bf16.msra.mxu1 %v1726_v22 }
 0x753   : > { %1154 = vmatprep.subr.bf16.mxu1 %v1731_v23 }
 0x756   : > { %1155 = vmatpush1.bf16.msra.mxu1 %v1729_v24 }
 0x757   : > { %1156 = vmatprep.subr.bf16.mxu1 %v1734_v26 }
 0x75a   : > { %1157 = vmatpush1.bf16.msra.mxu1 %v1732_v27 }
 0x7d0   : > { %v1013_v13 = vpop.xlane.xlu0 %1012 }
 0x7d1   : > { %v1014_v14 = vmul.f32 0.0078125, %v1013_v13 }
 0x7d3   : > { %v1015_v15 = vsub.f32 %v2029_v6, %v1014_v14 }
 0x7d5   : > { %v1016_v16 = vmul.f32 %v1015_v15, %v1015_v15 }
 0x7d7   : > { %1017 = vadd.xlane.f32.xlu0 %v1016_v16 }
 0x864   : > { %v1018_v28 = vpop.xlane.xlu0 %1017 }
 0x865   : > { %v1019_v29 = vmul.f32 0.0078125, %v1018_v28 }
 0x867   : > { %v1020_v30 = vadd.f32 1e-06, %v1019_v29 }
 0x869   : > { %1761 = vrsqrt.f32 %v1020_v30 }
 0x873   : > { %v1762_v33 = vpop.eup %1761 }
 0x874   : > { %v1022_v34 = vmul.f32 %v1762_v33, %v1015_v15 }
 0x876   : > { %v1027_v37 = vmul.f32 %v1026_v32, %v1022_v34 }
 0x878   : > { %v1032_v39 = vadd.f32 %v1031_v35, %v1027_v37 }
 0x87a   : > { %v1033_v40 = vpack.c.bf16 %v1032_v39, %v1032_v39 }
 0x87c   : > { %1175 = vmatmul.mubr.bf16.vlgmr.msra.gmra.mrb[20].mxu1 %v1033_v40 }
 0x94f   : > { %v1176_v59 = vpop.f32.mrb[20].mxu1 }
 0x950   : > { %v1177_v60 = vadd.f32 %v1176_v59, %v1055_v57  ;;  %v1178_v3 = vpop.f32.mrb[21].mxu1 }
 0x951   : > { %v1179_v61 = vadd.f32 %v1178_v3, %v1059_v58  ;;  %v1180_v62 = vpop.f32.mrb[22].mxu1 }
 0x952   : > { %v1185_v63 = vmul.f32 0.70710677, %v1177_v60  ;;  %v1181_v1 = vpop.f32.mrb[23].mxu1  ;;  %v1183_v46 = vmul.f32 0.5, %v1177_v60 }
 0x953   : > { %v1186_v2 = vmul.f32 0.70710677, %v1179_v61  ;;  %v1184_v48 = vmul.f32 0.5, %v1179_v61 }
 0x954   : > { %v1187_v4 = vand.u32 2147483647, %v1185_v63  ;;  %vm1225_vm5 = vcmp.lt.f32.partialorder %v1185_v63, 0.0 }
 0x955   : > { %v1188_v5 = vand.u32 2147483647, %v1186_v2  ;;  %vm1226_vm6 = vcmp.lt.f32.partialorder %v1186_v2, 0.0 }
 0x956   : > { %v1189_v7 = vmul.f32 0.3275911, %v1187_v4  ;;  %v1213_v0 = vsub.f32 0.0, %v1187_v4 }
 0x957   : > { %v1190_v8 = vmul.f32 0.3275911, %v1188_v5  ;;  %v1214_v36 = vsub.f32 0.0, %v1188_v5 }
 0x958   : > { %v1191_v9 = vadd.f32 1.0, %v1189_v7  ;;  %v1215_v38 = vmul.f32 %v1213_v0, %v1187_v4 }
 0x959   : > { %v1192_v10 = vadd.f32 1.0, %v1190_v8  ;;  %v1216_v14 = vmul.f32 %v1214_v36, %v1188_v5 }
 0x95a   : > { %1763 = vrcp.f32 %v1191_v9  ;;  %v1217_v17 = vmul.f32 1.442695, %v1215_v38 }
 0x95b   : > { %1765 = vrcp.f32 %v1192_v10  ;;  %v1219_v20 = vmul.f32 1.442695, %v1216_v14 }
 0x95c   : > { %1767 = vpow2.f32 %v1217_v17 }
 0x95d   : > { %1769 = vpow2.f32 %v1219_v20 }
 0x964   : > { %v1764_v11 = vpop.eup %1763 }
 0x965   : > { %v1766_v12 = vpop.eup %1765  ;;  %v1195_v13 = vmul.f32 1.0614054, %v1764_v11 }
 0x966   : > { %v1196_v15 = vmul.f32 1.0614054, %v1766_v12  ;;  %v1768_v34 = vpop.eup %1767 }
 0x967   : > { %v1197_v16 = vadd.f32 -1.4531521, %v1195_v13  ;;  %v1770_v37 = vpop.eup %1769 }
 0x968   : > { %v1198_v18 = vadd.f32 -1.4531521, %v1196_v15 }
 0x969   : > { %v1199_v19 = vmul.f32 %v1764_v11, %v1197_v16 }
 0x96a   : > { %v1200_v21 = vmul.f32 %v1766_v12, %v1198_v18 }
 0x96b   : > { %v1201_v22 = vadd.f32 1.4214138, %v1199_v19 }
 0x96c   : > { %v1202_v23 = vadd.f32 1.4214138, %v1200_v21 }
 0x96d   : > { %v1203_v24 = vmul.f32 %v1764_v11, %v1201_v22 }
 0x96e   : > { %v1204_v26 = vmul.f32 %v1766_v12, %v1202_v23 }
 0x96f   : > { %v1205_v27 = vadd.f32 -0.28449672, %v1203_v24 }
 0x970   : > { %v1206_v28 = vadd.f32 -0.28449672, %v1204_v26 }
 0x971   : > { %v1207_v29 = vmul.f32 %v1764_v11, %v1205_v27 }
 0x972   : > { %v1208_v30 = vmul.f32 %v1766_v12, %v1206_v28 }
 0x973   : > { %v1209_v31 = vadd.f32 0.2548296, %v1207_v29 }
 0x974   : > { %v1210_v32 = vadd.f32 0.2548296, %v1208_v30 }
 0x975   : > { %v1211_v33 = vmul.f32 %v1764_v11, %v1209_v31 }
 0x976   : > { %v1212_v35 = vmul.f32 %v1766_v12, %v1210_v32 }
 0x977   : > { %v1221_v39 = vmul.f32 %v1768_v34, %v1211_v33 }
 0x978   : > { %v1222_v40 = vmul.f32 %v1770_v37, %v1212_v35 }
 0x979   : > { %v1223_v41 = vsub.f32 1.0, %v1221_v39 }
 0x97a   : > { %v1224_v42 = vsub.f32 1.0, %v1222_v40 }
 0x97b   : > { %v1227_v43 = vsub.f32 0.0, %v1223_v41 }
 0x97c   : > { %v1228_v44 = vsub.f32 0.0, %v1224_v42 }
 0x97d   : > { %v1229_v45 = vsel %vm1225_vm5, %v1227_v43, %v1223_v41 }
 0x97e   : > { %v1231_v25 = vadd.f32 1.0, %v1229_v45  ;;  %v1230_v47 = vsel %vm1226_vm6, %v1228_v44, %v1224_v42 }
 0x97f   : > { %v1232_v49 = vadd.f32 1.0, %v1230_v47 }
 0x980   : > { %v1233_v50 = vmul.f32 %v1231_v25, %v1183_v46 }
 0x981   : > { %v1234_v51 = vmul.f32 %v1232_v49, %v1184_v48 }
 0x982   : > { %v1235_v53 = vpack.c.bf16 %v1233_v50, %v1233_v50 }
 0x983   : > { %v1236_v52 = vpack.c.bf16 %v1234_v51, %v1234_v51 }
 0x985   : > { %1404 = vmatprep.mubr.bf16.mxu0 %v1236_v52 }
 0x986   : > { %1405 = vmatmul.mubr.bf16.vlgmr.msra.gmra.mrb[8].mxu0 %v1235_v53 }
 0xa59   : > { %v1588_v54 = vpop.f32.mrb[8].mxu0 }
 0xa5a   : > { %v1589_v56 = vpop.f32.mrb[9].mxu0 }
 0xa5b   : > { %v1590_v57 = vadd.f32 %v1589_v56, %v1588_v54  ;;  %v1591_v58 = vpop.f32.mrb[10].mxu0 }
 0xa5c   : > { %v1592_v59 = vpop.f32.mrb[11].mxu0 }
 0xa5d   : > { %v1407_v60 = vadd.f32 %v1590_v57, %v1527_v55 }
 0xa5f   : > { %v1412_v3 = vadd.f32 %v1407_v60, %v2029_v6 }
 0xa61   : > { %1413 = vst [vmem:[%s381_s22] sm:$0xff] %v1412_v3 }
 0xa62 PF: > { %s21_s17 = sadd.s32 1, %s1777_s17  }
 0xa63   : > { %p18_p4 = scmp.ge.s32.totalorder %s21_s17, 4  }
 0xa65   :  { %20 = sbr.rel (!%p18_p4) target bundleno = 1 (0x1), region = 94 }

</bundles_post_ra>
